<compile_context>
chip_gen: v7x
topology: tpu7x:2x2x1
jax: 0.10.0
libtpu: 0.0.40
codegen_flags: <defaults>
</compile_context>

<pallas_src>
import math
from functools import partial

import jax
import jax.numpy as jnp
from jax.experimental import pallas as pl
from jax.experimental.pallas import tpu as pltpu


VMEM_LIMIT = 48 * 1024 * 1024   # explicit scoped-VMEM request (fits v7x 64 MiB)

# Order of the stacked per-layer parameter arrays (also the kernel arg order).
PARAM_NAMES = (
    "sa_wq", "sa_wk", "sa_wv", "sa_bq", "sa_bk", "sa_bv", "sa_wo", "sa_bo",
    "ca_wq", "ca_wk", "ca_wv", "ca_bq", "ca_bk", "ca_bv", "ca_wo", "ca_bo",
    "ln1_g", "ln1_b", "ln2_g", "ln2_b", "ln3_g", "ln3_b",
    "ff_w1", "ff_b1", "ff_w2", "ff_b2",
)


def _round_up(x, m):
    return (x + m - 1) // m * m


def _layernorm(x, gamma, beta, eps=1e-5):
    mu = jnp.mean(x, axis=-1, keepdims=True)
    var = jnp.mean((x - mu) ** 2, axis=-1, keepdims=True)
    return (x - mu) * jax.lax.rsqrt(var + eps) * gamma + beta


# ---------------------------------------------------------------------------
# Whole decoder stack in one pallas_call.
# grid = (B, n_layers); the (1, L, D) output block is the per-batch activation
# carry across the inner ("arbitrary") layer axis.
# ---------------------------------------------------------------------------
def decoder_stack_kernel(n_heads, *refs):
    mem_ref = refs[0]
    (sa_wq, sa_wk, sa_wv, sa_bq, sa_bk, sa_bv, sa_wo, sa_bo,
     ca_wq, ca_wk, ca_wv, ca_bq, ca_bk, ca_bv, ca_wo, ca_bo,
     ln1_g, ln1_b, ln2_g, ln2_b, ln3_g, ln3_b,
     ff_w1, ff_b1, ff_w2, ff_b2) = refs[1:27]
    o_ref = refs[27]

    layer = pl.program_id(1)
    L, D = mem_ref.shape[1], mem_ref.shape[2]
    H = n_heads
    scale = 1.0 / math.sqrt(D // H)

    @pl.when(layer == 0)
    def _():                          # initialise the carry with embeds(+PE)
        o_ref[0] = mem_ref[0]

    x = o_ref[0]                      # (L, D) f32 activation carry
    mem_b = jnp.broadcast_to(mem_ref[0].astype(jnp.bfloat16)[None], (H, L, D))

    # Causal additive mask built in-kernel (no HBM traffic, no VMEM input).
    row = jax.lax.broadcasted_iota(jnp.int32, (L, L), 0)
    col = jax.lax.broadcasted_iota(jnp.int32, (L, L), 1)
    mask = jnp.where(col > row, jnp.float32(-1e30), jnp.float32(0.0))

    def attend(q_in, kv_in, wq, wk, wv, bq, bk, bv, wo, bo):
        # q_in / kv_in: (H, L, D) bf16 broadcasts; weights per-head (H, D, dh).
        q = jnp.einsum("hld,hdk->hlk", q_in, wq[0],
                       preferred_element_type=jnp.float32) + bq[0]
        k = jnp.einsum("hld,hdk->hlk", kv_in, wk[0],
                       preferred_element_type=jnp.float32) + bk[0]
        v = jnp.einsum("hld,hdk->hlk", kv_in, wv[0],
                       preferred_element_type=jnp.float32) + bv[0]
        # Head-batched scores + f32 softmax.
        s = jnp.einsum("hqd,hkd->hqk", q.astype(jnp.bfloat16),
                       k.astype(jnp.bfloat16),
                       preferred_element_type=jnp.float32) * scale + mask[None]
        s = s - jnp.max(s, axis=-1, keepdims=True)
        p = jnp.exp(s)
        p = p * pl.reciprocal(jnp.sum(p, axis=-1, keepdims=True), approx=True)
        o = jnp.einsum("hqk,hkd->hqd", p.astype(jnp.bfloat16),
                       v.astype(jnp.bfloat16),
                       preferred_element_type=jnp.float32)
        # Per-head output projection + head-sum  (== concat_heads @ Wo.T).
        o = jnp.einsum("hqd,hdk->hqk", o.astype(jnp.bfloat16), wo[0],
                       preferred_element_type=jnp.float32)
        return jnp.sum(o, axis=0) + bo[0]

    # ---- self-attention block (post-norm) ----
    x_b = jnp.broadcast_to(x.astype(jnp.bfloat16)[None], (H, L, D))
    sa = attend(x_b, x_b, sa_wq, sa_wk, sa_wv, sa_bq, sa_bk, sa_bv, sa_wo, sa_bo)
    x = _layernorm(x + sa, ln1_g[0], ln1_b[0])

    # ---- cross-attention over memory (= embeds), same causal mask ----
    x_b = jnp.broadcast_to(x.astype(jnp.bfloat16)[None], (H, L, D))
    ca = attend(x_b, mem_b, ca_wq, ca_wk, ca_wv, ca_bq, ca_bk, ca_bv, ca_wo, ca_bo)
    x = _layernorm(x + ca, ln2_g[0], ln2_b[0])

    # ---- feed-forward block ----
    h = jnp.maximum(jnp.dot(x.astype(jnp.bfloat16), ff_w1[0],
                            preferred_element_type=jnp.float32) + ff_b1[0], 0.0)
    ff = jnp.dot(h.astype(jnp.bfloat16), ff_w2[0],
                 preferred_element_type=jnp.float32) + ff_b2[0]
    x = _layernorm(x + ff, ln3_g[0], ln3_b[0])

    o_ref[0] = x                      # carry / final output


def decoder_stack(embeds, layers, n_heads):
    B, L, D = embeds.shape
    n_layers = layers[PARAM_NAMES[0]].shape[0]

    def _layer_spec(arr):
        zeros = (0,) * (arr.ndim - 1)
        return pl.BlockSpec((1,) + tuple(arr.shape[1:]),
                            lambda b, l, _z=zeros: (l,) + _z)

    ordered = [layers[name] for name in PARAM_NAMES]
    in_specs = ([pl.BlockSpec((1, L, D), lambda b, l: (b, 0, 0))]
                + [_layer_spec(a) for a in ordered])

    return pl.pallas_call(
        partial(decoder_stack_kernel, n_heads),
        out_shape=jax.ShapeDtypeStruct((B, L, D), jnp.float32),
        grid=(B, n_layers),
        in_specs=in_specs,
        out_specs=pl.BlockSpec((1, L, D), lambda b, l: (b, 0, 0)),
        compiler_params=pltpu.CompilerParams(
            dimension_semantics=("parallel", "arbitrary"),
            vmem_limit_bytes=VMEM_LIMIT),
    )(embeds, *ordered)


# ---------------------------------------------------------------------------
# Final vocab projection: tiled (rows x vocab) matmul, lane-dense output.
# ---------------------------------------------------------------------------
def final_linear_kernel(x_ref, w_ref, b_ref, o_ref):
    o_ref[...] = (jnp.dot(x_ref[...], w_ref[...],
                          preferred_element_type=jnp.float32) + b_ref[...])


def final_linear(x2d, w_t, b_row):
    # x2d: (N, D) f32; w_t: (D, Vp) bf16 pre-transposed & padded; b_row: (1, Vp)
    N, D = x2d.shape
    Vp = w_t.shape[1]
    TM, TN = 128, 128
    Np = _round_up(N, TM)
    x_p = jnp.zeros((Np, D), jnp.bfloat16).at[:N].set(x2d.astype(jnp.bfloat16))
    out = pl.pallas_call(
        final_linear_kernel,
        out_shape=jax.ShapeDtypeStruct((Np, Vp), jnp.float32),
        grid=(Np // TM, Vp // TN),
        in_specs=[pl.BlockSpec((TM, D), lambda i, j: (i, 0)),
                  pl.BlockSpec((D, TN), lambda i, j: (0, j)),
                  pl.BlockSpec((1, TN), lambda i, j: (0, j))],
        out_specs=pl.BlockSpec((TM, TN), lambda i, j: (i, j)),
        compiler_params=pltpu.CompilerParams(
            dimension_semantics=("parallel", "parallel"),
            vmem_limit_bytes=VMEM_LIMIT),
    )(x_p, w_t, b_row)
    return out[:N]


# ---------------------------------------------------------------------------
# Parameter construction (deterministic, synthetic), pre-arranged for kernels.
# ---------------------------------------------------------------------------
def make_params(key, vocab, D, Hf, n_layers, n_heads, pad_id):
    dh = D // n_heads
    keys = iter(jax.random.split(key, 10 * n_layers + 4))

    def w(shape, scale=0.05):
        return (scale * jax.random.normal(next(keys), shape)).astype(jnp.float32)

    emb = w((vocab, D), 0.1).at[pad_id].set(0.0)        # padding_idx row zero

    def per_head_in(W):   # PyTorch (D_out, D_in) -> (H, D, dh): x @ W[rows_h].T
        return jnp.swapaxes(W.reshape(n_heads, dh, D), 1, 2).astype(jnp.bfloat16)

    def per_head_out(W):  # out_proj (D, D) -> (H, dh, D): sum_h o_h @ W[:,cols_h].T
        return W.T.reshape(n_heads, dh, D).astype(jnp.bfloat16)

    acc = {n: [] for n in PARAM_NAMES}
    zero_hb = jnp.zeros((n_heads, 1, dh), jnp.float32)
    zero_d = jnp.zeros((1, D), jnp.float32)
    ones_d = jnp.ones((1, D), jnp.float32)
    for _ in range(n_layers):
        for p in ("sa", "ca"):
            acc[f"{p}_wq"].append(per_head_in(w((D, D))))
            acc[f"{p}_wk"].append(per_head_in(w((D, D))))
            acc[f"{p}_wv"].append(per_head_in(w((D, D))))
            acc[f"{p}_bq"].append(zero_hb)
            acc[f"{p}_bk"].append(zero_hb)
            acc[f"{p}_bv"].append(zero_hb)
            acc[f"{p}_wo"].append(per_head_out(w((D, D))))
            acc[f"{p}_bo"].append(zero_d)
        for i in (1, 2, 3):
            acc[f"ln{i}_g"].append(ones_d)
            acc[f"ln{i}_b"].append(zero_d)
        acc["ff_w1"].append(w((Hf, D)).T.astype(jnp.bfloat16))   # (D, Hf)
        acc["ff_b1"].append(jnp.zeros((1, Hf), jnp.float32))
        acc["ff_w2"].append(w((D, Hf)).T.astype(jnp.bfloat16))   # (Hf, D)
        acc["ff_b2"].append(zero_d)
    layers = {n: jnp.stack(v) for n, v in acc.items()}

    w_out = w((vocab, D))
    Vp = _round_up(vocab, 128)                                   # lane-dense V
    w_out_t = (jnp.zeros((D, Vp), jnp.float32).at[:, :vocab].set(w_out.T)
               .astype(jnp.bfloat16))
    b_out = jnp.zeros((1, Vp), jnp.float32)
    return emb, layers, w_out_t, b_out


def sinusoidal_pe(max_len, D):
    pos = jnp.arange(max_len, dtype=jnp.float32)[:, None]
    div = jnp.exp(jnp.arange(0, D, 2, dtype=jnp.float32) * (-math.log(10000.0) / D))
    pe = jnp.zeros((max_len, D), jnp.float32)
    pe = pe.at[:, 0::2].set(jnp.sin(pos * div))
    pe = pe.at[:, 1::2].set(jnp.cos(pos * div))
    return pe


# ---------------------------------------------------------------------------
# Full forward pass
# ---------------------------------------------------------------------------
def transformer_lm_forward(indices, lengths, emb, layers, w_out_t, b_out,
                           pe_table, vocab, n_heads):
    del lengths                     # reference forward builds mask from seq len
    B, L = indices.shape
    D = emb.shape[1]

    embeds = emb[indices] + pe_table[:L][None, :, :]     # gather + PE (JAX glue)
    x = decoder_stack(embeds, layers, n_heads)           # (B, L, D) f32
    logits = final_linear(x.reshape(B * L, D), w_out_t, b_out)
    return logits[:, :vocab].reshape(B, L, vocab)


if __name__ == "__main__":
    # small synthetic config
    VOCAB = 50
    EMBED_DIM = 32
    HIDDEN = 64
    N_LAYERS = 2
    N_HEADS = 4
    MAX_LEN = 16
    PAD_ID = 0
    B, L = 2, 8

    key = jax.random.PRNGKey(0)
    k_param, k_idx = jax.random.split(key)

    emb, layers, w_out_t, b_out = make_params(k_param, VOCAB, EMBED_DIM, HIDDEN,
                                              N_LAYERS, N_HEADS, PAD_ID)
    pe_table = sinusoidal_pe(MAX_LEN, EMBED_DIM)

    indices = jax.random.randint(k_idx, (B, L), 1, VOCAB, dtype=jnp.int32)
    lengths = jnp.full((B,), L, dtype=jnp.int32)

    logits = transformer_lm_forward(indices, lengths, emb, layers, w_out_t,
                                    b_out, pe_table, VOCAB, N_HEADS)
    logits = jax.block_until_ready(logits)

    assert logits.shape == (B, L, VOCAB)
    assert bool(jnp.all(jnp.isfinite(logits)))
    print("KERNEL_OK")
</pallas_src>

<mosaic_0001>
module attributes {stable_mosaic.version = 11 : i64} {
  func.func @decoder_stack_kernel(%arg0: i32, %arg1: i32, %arg2: memref<1x8x32xf32, #tpu.memory_space<vmem>>, %arg3: memref<1x4x32x8xbf16, #tpu.memory_space<vmem>>, %arg4: memref<1x4x32x8xbf16, #tpu.memory_space<vmem>>, %arg5: memref<1x4x32x8xbf16, #tpu.memory_space<vmem>>, %arg6: memref<1x4x1x8xf32, #tpu.memory_space<vmem>>, %arg7: memref<1x4x1x8xf32, #tpu.memory_space<vmem>>, %arg8: memref<1x4x1x8xf32, #tpu.memory_space<vmem>>, %arg9: memref<1x4x8x32xbf16, #tpu.memory_space<vmem>>, %arg10: memref<1x1x32xf32, #tpu.memory_space<vmem>>, %arg11: memref<1x4x32x8xbf16, #tpu.memory_space<vmem>>, %arg12: memref<1x4x32x8xbf16, #tpu.memory_space<vmem>>, %arg13: memref<1x4x32x8xbf16, #tpu.memory_space<vmem>>, %arg14: memref<1x4x1x8xf32, #tpu.memory_space<vmem>>, %arg15: memref<1x4x1x8xf32, #tpu.memory_space<vmem>>, %arg16: memref<1x4x1x8xf32, #tpu.memory_space<vmem>>, %arg17: memref<1x4x8x32xbf16, #tpu.memory_space<vmem>>, %arg18: memref<1x1x32xf32, #tpu.memory_space<vmem>>, %arg19: memref<1x1x32xf32, #tpu.memory_space<vmem>>, %arg20: memref<1x1x32xf32, #tpu.memory_space<vmem>>, %arg21: memref<1x1x32xf32, #tpu.memory_space<vmem>>, %arg22: memref<1x1x32xf32, #tpu.memory_space<vmem>>, %arg23: memref<1x1x32xf32, #tpu.memory_space<vmem>>, %arg24: memref<1x1x32xf32, #tpu.memory_space<vmem>>, %arg25: memref<1x32x64xbf16, #tpu.memory_space<vmem>>, %arg26: memref<1x1x64xf32, #tpu.memory_space<vmem>>, %arg27: memref<1x64x32xbf16, #tpu.memory_space<vmem>>, %arg28: memref<1x1x32xf32, #tpu.memory_space<vmem>>, %arg29: memref<1x8x32xf32, #tpu.memory_space<vmem>>) attributes {dimension_semantics = [#tpu.dimension_semantics<parallel>, #tpu.dimension_semantics<arbitrary>], iteration_bounds = array<i64: 2, 2>, scalar_prefetch = 0 : i64, scratch_operands = 0 : i64, tpu.core_type = #tpu.core_type<tc>, window_params = [{transform_indices = @transform_0, window_bounds = array<i64: 1, 8, 32>}, {transform_indices = @transform_1, window_bounds = array<i64: 1, 4, 32, 8>}, {transform_indices = @transform_2, window_bounds = array<i64: 1, 4, 32, 8>}, {transform_indices = @transform_3, window_bounds = array<i64: 1, 4, 32, 8>}, {transform_indices = @transform_4, window_bounds = array<i64: 1, 4, 1, 8>}, {transform_indices = @transform_5, window_bounds = array<i64: 1, 4, 1, 8>}, {transform_indices = @transform_6, window_bounds = array<i64: 1, 4, 1, 8>}, {transform_indices = @transform_7, window_bounds = array<i64: 1, 4, 8, 32>}, {transform_indices = @transform_8, window_bounds = array<i64: 1, 1, 32>}, {transform_indices = @transform_9, window_bounds = array<i64: 1, 4, 32, 8>}, {transform_indices = @transform_10, window_bounds = array<i64: 1, 4, 32, 8>}, {transform_indices = @transform_11, window_bounds = array<i64: 1, 4, 32, 8>}, {transform_indices = @transform_12, window_bounds = array<i64: 1, 4, 1, 8>}, {transform_indices = @transform_13, window_bounds = array<i64: 1, 4, 1, 8>}, {transform_indices = @transform_14, window_bounds = array<i64: 1, 4, 1, 8>}, {transform_indices = @transform_15, window_bounds = array<i64: 1, 4, 8, 32>}, {transform_indices = @transform_16, window_bounds = array<i64: 1, 1, 32>}, {transform_indices = @transform_17, window_bounds = array<i64: 1, 1, 32>}, {transform_indices = @transform_18, window_bounds = array<i64: 1, 1, 32>}, {transform_indices = @transform_19, window_bounds = array<i64: 1, 1, 32>}, {transform_indices = @transform_20, window_bounds = array<i64: 1, 1, 32>}, {transform_indices = @transform_21, window_bounds = array<i64: 1, 1, 32>}, {transform_indices = @transform_22, window_bounds = array<i64: 1, 1, 32>}, {transform_indices = @transform_23, window_bounds = array<i64: 1, 32, 64>}, {transform_indices = @transform_24, window_bounds = array<i64: 1, 1, 64>}, {transform_indices = @transform_25, window_bounds = array<i64: 1, 64, 32>}, {transform_indices = @transform_26, window_bounds = array<i64: 1, 1, 32>}, {transform_indices = @transform_27, window_bounds = array<i64: 1, 8, 32>}]} {
    %c0_i32 = arith.constant 0 : i32
    %0 = arith.cmpi eq, %arg1, %c0_i32 : i32
    %1 = arith.extui %0 : i1 to i32
    %c0_i32_0 = arith.constant 0 : i32
    %2 = arith.cmpi ne, %1, %c0_i32_0 : i32
    scf.if %2 {
      %c0_140 = arith.constant 0 : index
      %c0_141 = arith.constant 0 : index
      %c0_142 = arith.constant 0 : index
      %229 = vector.load %arg2[%c0_140, %c0_141, %c0_142] : memref<1x8x32xf32, #tpu.memory_space<vmem>>, vector<1x8x32xf32>
      %230 = vector.shape_cast %229 : vector<1x8x32xf32> to vector<8x32xf32>
      %c0_143 = arith.constant 0 : index
      %c0_144 = arith.constant 0 : index
      %c0_145 = arith.constant 0 : index
      %231 = vector.load %arg29[%c0_143, %c0_144, %c0_145] : memref<1x8x32xf32, #tpu.memory_space<vmem>>, vector<1x8x32xf32>
      %232 = vector.shape_cast %231 : vector<1x8x32xf32> to vector<8x32xf32>
      %233 = vector.shape_cast %230 : vector<8x32xf32> to vector<1x8x32xf32>
      tpu.vector_store %arg29[%c0_143, %c0_144, %c0_145], %233 {strides = array<i32>} : memref<1x8x32xf32, #tpu.memory_space<vmem>>, vector<1x8x32xf32>,
    } else {
    }
    %c0 = arith.constant 0 : index
    %c0_1 = arith.constant 0 : index
    %c0_2 = arith.constant 0 : index
    %3 = vector.load %arg29[%c0, %c0_1, %c0_2] : memref<1x8x32xf32, #tpu.memory_space<vmem>>, vector<1x8x32xf32>
    %4 = vector.shape_cast %3 : vector<1x8x32xf32> to vector<8x32xf32>
    %c0_3 = arith.constant 0 : index
    %c0_4 = arith.constant 0 : index
    %c0_5 = arith.constant 0 : index
    %5 = vector.load %arg2[%c0_3, %c0_4, %c0_5] : memref<1x8x32xf32, #tpu.memory_space<vmem>>, vector<1x8x32xf32>
    %6 = vector.shape_cast %5 : vector<1x8x32xf32> to vector<8x32xf32>
    %7 = arith.truncf %6 : vector<8x32xf32> to vector<8x32xbf16>
    %8 = vector.shape_cast %7 : vector<8x32xbf16> to vector<1x8x32xbf16>
    %9 = vector.shape_cast %8 : vector<1x8x32xbf16> to vector<1x8x32xbf16>
    %10 = vector.broadcast %9 : vector<1x8x32xbf16> to vector<4x8x32xbf16>
    %11 = tpu.iota {dimensions = array<i32: 0>} : vector<8x8xi32>
    %12 = tpu.iota {dimensions = array<i32: 1>} : vector<8x8xi32>
    %13 = arith.cmpi sgt, %12, %11 : vector<8x8xi32>
    %cst = arith.constant -1.000000e+30 : f32
    %cst_6 = arith.constant 0.000000e+00 : f32
    %14 = vector.broadcast %cst : f32 to vector<8x8xf32>
    %15 = vector.broadcast %cst_6 : f32 to vector<8x8xf32>
    %16 = arith.select %13, %14, %15 : vector<8x8xi1>, vector<8x8xf32>
    %17 = arith.truncf %4 : vector<8x32xf32> to vector<8x32xbf16>
    %18 = vector.shape_cast %17 : vector<8x32xbf16> to vector<1x8x32xbf16>
    %19 = vector.shape_cast %18 : vector<1x8x32xbf16> to vector<1x8x32xbf16>
    %20 = vector.broadcast %19 : vector<1x8x32xbf16> to vector<4x8x32xbf16>
    %c0_7 = arith.constant 0 : index
    %c0_8 = arith.constant 0 : index
    %c0_9 = arith.constant 0 : index
    %c0_10 = arith.constant 0 : index
    %21 = vector.load %arg3[%c0_7, %c0_8, %c0_9, %c0_10] : memref<1x4x32x8xbf16, #tpu.memory_space<vmem>>, vector<1x4x32x8xbf16>
    %22 = vector.shape_cast %21 : vector<1x4x32x8xbf16> to vector<4x32x8xbf16>
    "tpu.trace_start"() <{level = 10 : i32, message = "hld,hdk->hlk"}> : () -> ()
    %cst_11 = arith.constant dense<0.000000e+00> : vector<4x8x8xf32>
    %23 = tpu.matmul %20, %22, %cst_11 {dimension_numbers = #tpu.dot_dimension_numbers<[2], [1], [1], [2], [0, 0, 0, 1, 1, 2], [0], [0]>} : vector<4x8x32xbf16>, vector<4x32x8xbf16>, vector<4x8x8xf32> -> vector<4x8x8xf32>
    "tpu.trace_stop"() : () -> ()
    %c0_12 = arith.constant 0 : index
    %c0_13 = arith.constant 0 : index
    %c0_14 = arith.constant 0 : index
    %c0_15 = arith.constant 0 : index
    %24 = vector.load %arg6[%c0_12, %c0_13, %c0_14, %c0_15] : memref<1x4x1x8xf32, #tpu.memory_space<vmem>>, vector<1x4x1x8xf32>
    %25 = vector.shape_cast %24 : vector<1x4x1x8xf32> to vector<4x1x8xf32>
    %26 = vector.broadcast %25 : vector<4x1x8xf32> to vector<4x8x8xf32>
    %27 = arith.addf %23, %26 : vector<4x8x8xf32>
    %c0_16 = arith.constant 0 : index
    %c0_17 = arith.constant 0 : index
    %c0_18 = arith.constant 0 : index
    %c0_19 = arith.constant 0 : index
    %28 = vector.load %arg4[%c0_16, %c0_17, %c0_18, %c0_19] : memref<1x4x32x8xbf16, #tpu.memory_space<vmem>>, vector<1x4x32x8xbf16>
    %29 = vector.shape_cast %28 : vector<1x4x32x8xbf16> to vector<4x32x8xbf16>
    "tpu.trace_start"() <{level = 10 : i32, message = "hld,hdk->hlk"}> : () -> ()
    %cst_20 = arith.constant dense<0.000000e+00> : vector<4x8x8xf32>
    %30 = tpu.matmul %20, %29, %cst_20 {dimension_numbers = #tpu.dot_dimension_numbers<[2], [1], [1], [2], [0, 0, 0, 1, 1, 2], [0], [0]>} : vector<4x8x32xbf16>, vector<4x32x8xbf16>, vector<4x8x8xf32> -> vector<4x8x8xf32>
    "tpu.trace_stop"() : () -> ()
    %c0_21 = arith.constant 0 : index
    %c0_22 = arith.constant 0 : index
    %c0_23 = arith.constant 0 : index
    %c0_24 = arith.constant 0 : index
    %31 = vector.load %arg7[%c0_21, %c0_22, %c0_23, %c0_24] : memref<1x4x1x8xf32, #tpu.memory_space<vmem>>, vector<1x4x1x8xf32>
    %32 = vector.shape_cast %31 : vector<1x4x1x8xf32> to vector<4x1x8xf32>
    %33 = vector.broadcast %32 : vector<4x1x8xf32> to vector<4x8x8xf32>
    %34 = arith.addf %30, %33 : vector<4x8x8xf32>
    %c0_25 = arith.constant 0 : index
    %c0_26 = arith.constant 0 : index
    %c0_27 = arith.constant 0 : index
    %c0_28 = arith.constant 0 : index
    %35 = vector.load %arg5[%c0_25, %c0_26, %c0_27, %c0_28] : memref<1x4x32x8xbf16, #tpu.memory_space<vmem>>, vector<1x4x32x8xbf16>
    %36 = vector.shape_cast %35 : vector<1x4x32x8xbf16> to vector<4x32x8xbf16>
    "tpu.trace_start"() <{level = 10 : i32, message = "hld,hdk->hlk"}> : () -> ()
    %cst_29 = arith.constant dense<0.000000e+00> : vector<4x8x8xf32>
    %37 = tpu.matmul %20, %36, %cst_29 {dimension_numbers = #tpu.dot_dimension_numbers<[2], [1], [1], [2], [0, 0, 0, 1, 1, 2], [0], [0]>} : vector<4x8x32xbf16>, vector<4x32x8xbf16>, vector<4x8x8xf32> -> vector<4x8x8xf32>
    "tpu.trace_stop"() : () -> ()
    %c0_30 = arith.constant 0 : index
    %c0_31 = arith.constant 0 : index
    %c0_32 = arith.constant 0 : index
    %c0_33 = arith.constant 0 : index
    %38 = vector.load %arg8[%c0_30, %c0_31, %c0_32, %c0_33] : memref<1x4x1x8xf32, #tpu.memory_space<vmem>>, vector<1x4x1x8xf32>
    %39 = vector.shape_cast %38 : vector<1x4x1x8xf32> to vector<4x1x8xf32>
    %40 = vector.broadcast %39 : vector<4x1x8xf32> to vector<4x8x8xf32>
    %41 = arith.addf %37, %40 : vector<4x8x8xf32>
    %42 = arith.truncf %27 : vector<4x8x8xf32> to vector<4x8x8xbf16>
    %43 = arith.truncf %34 : vector<4x8x8xf32> to vector<4x8x8xbf16>
    "tpu.trace_start"() <{level = 10 : i32, message = "hqd,hkd->hqk"}> : () -> ()
    %cst_34 = arith.constant dense<0.000000e+00> : vector<4x8x8xf32>
    %44 = tpu.matmul %42, %43, %cst_34 {dimension_numbers = #tpu.dot_dimension_numbers<[2], [2], [1], [1], [0, 0, 0, 1, 1, 1], [0], [0]>} : vector<4x8x8xbf16>, vector<4x8x8xbf16>, vector<4x8x8xf32> -> vector<4x8x8xf32>
    "tpu.trace_stop"() : () -> ()
    %cst_35 = arith.constant 0.353553385 : f32
    %45 = vector.broadcast %cst_35 : f32 to vector<4x8x8xf32>
    %46 = arith.mulf %44, %45 : vector<4x8x8xf32>
    %47 = vector.shape_cast %16 : vector<8x8xf32> to vector<1x8x8xf32>
    %48 = vector.broadcast %47 : vector<1x8x8xf32> to vector<4x8x8xf32>
    %49 = arith.addf %46, %48 : vector<4x8x8xf32>
    %cst_36 = arith.constant dense<0xFF800000> : vector<4x8xf32>
    %50 = vector.multi_reduction <maximumf>, %49, %cst_36 [2] : vector<4x8x8xf32> to vector<4x8xf32>
    %51 = vector.shape_cast %50 : vector<4x8xf32> to vector<4x8x1xf32>
    %52 = vector.broadcast %51 : vector<4x8x1xf32> to vector<4x8x8xf32>
    %53 = arith.subf %49, %52 : vector<4x8x8xf32>
    %54 = math.exp %53 : vector<4x8x8xf32>
    %cst_37 = arith.constant dense<0.000000e+00> : vector<4x8xf32>
    %55 = vector.multi_reduction <add>, %54, %cst_37 [2] : vector<4x8x8xf32> to vector<4x8xf32>
    %56 = vector.shape_cast %55 : vector<4x8xf32> to vector<4x8x1xf32>
    %57 = tpu.reciprocal %56 {approx = true} : vector<4x8x1xf32> -> vector<4x8x1xf32>
    %58 = vector.broadcast %57 : vector<4x8x1xf32> to vector<4x8x8xf32>
    %59 = arith.mulf %54, %58 : vector<4x8x8xf32>
    %60 = arith.truncf %59 : vector<4x8x8xf32> to vector<4x8x8xbf16>
    %61 = arith.truncf %41 : vector<4x8x8xf32> to vector<4x8x8xbf16>
    "tpu.trace_start"() <{level = 10 : i32, message = "hqk,hkd->hqd"}> : () -> ()
    %cst_38 = arith.constant dense<0.000000e+00> : vector<4x8x8xf32>
    %62 = tpu.matmul %60, %61, %cst_38 {dimension_numbers = #tpu.dot_dimension_numbers<[2], [1], [1], [2], [0, 0, 0, 1, 1, 2], [0], [0]>} : vector<4x8x8xbf16>, vector<4x8x8xbf16>, vector<4x8x8xf32> -> vector<4x8x8xf32>
    "tpu.trace_stop"() : () -> ()
    %63 = arith.truncf %62 : vector<4x8x8xf32> to vector<4x8x8xbf16>
    %c0_39 = arith.constant 0 : index
    %c0_40 = arith.constant 0 : index
    %c0_41 = arith.constant 0 : index
    %c0_42 = arith.constant 0 : index
    %64 = vector.load %arg9[%c0_39, %c0_40, %c0_41, %c0_42] : memref<1x4x8x32xbf16, #tpu.memory_space<vmem>>, vector<1x4x8x32xbf16>
    %65 = vector.shape_cast %64 : vector<1x4x8x32xbf16> to vector<4x8x32xbf16>
    "tpu.trace_start"() <{level = 10 : i32, message = "hqd,hdk->hqk"}> : () -> ()
    %cst_43 = arith.constant dense<0.000000e+00> : vector<4x8x32xf32>
    %66 = tpu.matmul %63, %65, %cst_43 {dimension_numbers = #tpu.dot_dimension_numbers<[2], [1], [1], [2], [0, 0, 0, 1, 1, 2], [0], [0]>} : vector<4x8x8xbf16>, vector<4x8x32xbf16>, vector<4x8x32xf32> -> vector<4x8x32xf32>
    "tpu.trace_stop"() : () -> ()
    %cst_44 = arith.constant dense<0.000000e+00> : vector<8x32xf32>
    %67 = vector.multi_reduction <add>, %66, %cst_44 [0] : vector<4x8x32xf32> to vector<8x32xf32>
    %c0_45 = arith.constant 0 : index
    %c0_46 = arith.constant 0 : index
    %c0_47 = arith.constant 0 : index
    %68 = vector.load %arg10[%c0_45, %c0_46, %c0_47] : memref<1x1x32xf32, #tpu.memory_space<vmem>>, vector<1x1x32xf32>
    %69 = vector.shape_cast %68 : vector<1x1x32xf32> to vector<1x32xf32>
    %70 = vector.broadcast %69 : vector<1x32xf32> to vector<8x32xf32>
    %71 = arith.addf %67, %70 : vector<8x32xf32>
    %72 = arith.addf %4, %71 : vector<8x32xf32>
    %c0_48 = arith.constant 0 : index
    %c0_49 = arith.constant 0 : index
    %c0_50 = arith.constant 0 : index
    %73 = vector.load %arg19[%c0_48, %c0_49, %c0_50] : memref<1x1x32xf32, #tpu.memory_space<vmem>>, vector<1x1x32xf32>
    %74 = vector.shape_cast %73 : vector<1x1x32xf32> to vector<1x32xf32>
    %c0_51 = arith.constant 0 : index
    %c0_52 = arith.constant 0 : index
    %c0_53 = arith.constant 0 : index
    %75 = vector.load %arg20[%c0_51, %c0_52, %c0_53] : memref<1x1x32xf32, #tpu.memory_space<vmem>>, vector<1x1x32xf32>
    %76 = vector.shape_cast %75 : vector<1x1x32xf32> to vector<1x32xf32>
    %cst_54 = arith.constant dense<0.000000e+00> : vector<8xf32>
    %77 = vector.multi_reduction <add>, %72, %cst_54 [1] : vector<8x32xf32> to vector<8xf32>
    %78 = vector.shape_cast %77 : vector<8xf32> to vector<8x1xf32>
    %cst_55 = arith.constant 3.200000e+01 : f32
    %79 = vector.broadcast %cst_55 : f32 to vector<8x1xf32>
    %80 = arith.divf %78, %79 : vector<8x1xf32>
    %81 = vector.broadcast %80 : vector<8x1xf32> to vector<8x32xf32>
    %82 = arith.subf %72, %81 : vector<8x32xf32>
    %83 = arith.mulf %82, %82 : vector<8x32xf32>
    %cst_56 = arith.constant dense<0.000000e+00> : vector<8xf32>
    %84 = vector.multi_reduction <add>, %83, %cst_56 [1] : vector<8x32xf32> to vector<8xf32>
    %85 = vector.shape_cast %84 : vector<8xf32> to vector<8x1xf32>
    %cst_57 = arith.constant 3.200000e+01 : f32
    %86 = vector.broadcast %cst_57 : f32 to vector<8x1xf32>
    %87 = arith.divf %85, %86 : vector<8x1xf32>
    %88 = vector.broadcast %80 : vector<8x1xf32> to vector<8x32xf32>
    %89 = arith.subf %72, %88 : vector<8x32xf32>
    %cst_58 = arith.constant 9.99999974E-6 : f32
    %90 = vector.broadcast %cst_58 : f32 to vector<8x1xf32>
    %91 = arith.addf %87, %90 : vector<8x1xf32>
    %92 = math.rsqrt %91 : vector<8x1xf32>
    %93 = vector.broadcast %92 : vector<8x1xf32> to vector<8x32xf32>
    %94 = arith.mulf %89, %93 : vector<8x32xf32>
    %95 = vector.broadcast %74 : vector<1x32xf32> to vector<8x32xf32>
    %96 = arith.mulf %94, %95 : vector<8x32xf32>
    %97 = vector.broadcast %76 : vector<1x32xf32> to vector<8x32xf32>
    %98 = arith.addf %96, %97 : vector<8x32xf32>
    %99 = arith.truncf %98 : vector<8x32xf32> to vector<8x32xbf16>
    %100 = vector.shape_cast %99 : vector<8x32xbf16> to vector<1x8x32xbf16>
    %101 = vector.shape_cast %100 : vector<1x8x32xbf16> to vector<1x8x32xbf16>
    %102 = vector.broadcast %101 : vector<1x8x32xbf16> to vector<4x8x32xbf16>
    %c0_59 = arith.constant 0 : index
    %c0_60 = arith.constant 0 : index
    %c0_61 = arith.constant 0 : index
    %c0_62 = arith.constant 0 : index
    %103 = vector.load %arg11[%c0_59, %c0_60, %c0_61, %c0_62] : memref<1x4x32x8xbf16, #tpu.memory_space<vmem>>, vector<1x4x32x8xbf16>
    %104 = vector.shape_cast %103 : vector<1x4x32x8xbf16> to vector<4x32x8xbf16>
    "tpu.trace_start"() <{level = 10 : i32, message = "hld,hdk->hlk"}> : () -> ()
    %cst_63 = arith.constant dense<0.000000e+00> : vector<4x8x8xf32>
    %105 = tpu.matmul %102, %104, %cst_63 {dimension_numbers = #tpu.dot_dimension_numbers<[2], [1], [1], [2], [0, 0, 0, 1, 1, 2], [0], [0]>} : vector<4x8x32xbf16>, vector<4x32x8xbf16>, vector<4x8x8xf32> -> vector<4x8x8xf32>
    "tpu.trace_stop"() : () -> ()
    %c0_64 = arith.constant 0 : index
    %c0_65 = arith.constant 0 : index
    %c0_66 = arith.constant 0 : index
    %c0_67 = arith.constant 0 : index
    %106 = vector.load %arg14[%c0_64, %c0_65, %c0_66, %c0_67] : memref<1x4x1x8xf32, #tpu.memory_space<vmem>>, vector<1x4x1x8xf32>
    %107 = vector.shape_cast %106 : vector<1x4x1x8xf32> to vector<4x1x8xf32>
    %108 = vector.broadcast %107 : vector<4x1x8xf32> to vector<4x8x8xf32>
    %109 = arith.addf %105, %108 : vector<4x8x8xf32>
    %c0_68 = arith.constant 0 : index
    %c0_69 = arith.constant 0 : index
    %c0_70 = arith.constant 0 : index
    %c0_71 = arith.constant 0 : index
    %110 = vector.load %arg12[%c0_68, %c0_69, %c0_70, %c0_71] : memref<1x4x32x8xbf16, #tpu.memory_space<vmem>>, vector<1x4x32x8xbf16>
    %111 = vector.shape_cast %110 : vector<1x4x32x8xbf16> to vector<4x32x8xbf16>
    "tpu.trace_start"() <{level = 10 : i32, message = "hld,hdk->hlk"}> : () -> ()
    %cst_72 = arith.constant dense<0.000000e+00> : vector<4x8x8xf32>
    %112 = tpu.matmul %10, %111, %cst_72 {dimension_numbers = #tpu.dot_dimension_numbers<[2], [1], [1], [2], [0, 0, 0, 1, 1, 2], [0], [0]>} : vector<4x8x32xbf16>, vector<4x32x8xbf16>, vector<4x8x8xf32> -> vector<4x8x8xf32>
    "tpu.trace_stop"() : () -> ()
    %c0_73 = arith.constant 0 : index
    %c0_74 = arith.constant 0 : index
    %c0_75 = arith.constant 0 : index
    %c0_76 = arith.constant 0 : index
    %113 = vector.load %arg15[%c0_73, %c0_74, %c0_75, %c0_76] : memref<1x4x1x8xf32, #tpu.memory_space<vmem>>, vector<1x4x1x8xf32>
    %114 = vector.shape_cast %113 : vector<1x4x1x8xf32> to vector<4x1x8xf32>
    %115 = vector.broadcast %114 : vector<4x1x8xf32> to vector<4x8x8xf32>
    %116 = arith.addf %112, %115 : vector<4x8x8xf32>
    %c0_77 = arith.constant 0 : index
    %c0_78 = arith.constant 0 : index
    %c0_79 = arith.constant 0 : index
    %c0_80 = arith.constant 0 : index
    %117 = vector.load %arg13[%c0_77, %c0_78, %c0_79, %c0_80] : memref<1x4x32x8xbf16, #tpu.memory_space<vmem>>, vector<1x4x32x8xbf16>
    %118 = vector.shape_cast %117 : vector<1x4x32x8xbf16> to vector<4x32x8xbf16>
    "tpu.trace_start"() <{level = 10 : i32, message = "hld,hdk->hlk"}> : () -> ()
    %cst_81 = arith.constant dense<0.000000e+00> : vector<4x8x8xf32>
    %119 = tpu.matmul %10, %118, %cst_81 {dimension_numbers = #tpu.dot_dimension_numbers<[2], [1], [1], [2], [0, 0, 0, 1, 1, 2], [0], [0]>} : vector<4x8x32xbf16>, vector<4x32x8xbf16>, vector<4x8x8xf32> -> vector<4x8x8xf32>
    "tpu.trace_stop"() : () -> ()
    %c0_82 = arith.constant 0 : index
    %c0_83 = arith.constant 0 : index
    %c0_84 = arith.constant 0 : index
    %c0_85 = arith.constant 0 : index
    %120 = vector.load %arg16[%c0_82, %c0_83, %c0_84, %c0_85] : memref<1x4x1x8xf32, #tpu.memory_space<vmem>>, vector<1x4x1x8xf32>
    %121 = vector.shape_cast %120 : vector<1x4x1x8xf32> to vector<4x1x8xf32>
    %122 = vector.broadcast %121 : vector<4x1x8xf32> to vector<4x8x8xf32>
    %123 = arith.addf %119, %122 : vector<4x8x8xf32>
    %124 = arith.truncf %109 : vector<4x8x8xf32> to vector<4x8x8xbf16>
    %125 = arith.truncf %116 : vector<4x8x8xf32> to vector<4x8x8xbf16>
    "tpu.trace_start"() <{level = 10 : i32, message = "hqd,hkd->hqk"}> : () -> ()
    %cst_86 = arith.constant dense<0.000000e+00> : vector<4x8x8xf32>
    %126 = tpu.matmul %124, %125, %cst_86 {dimension_numbers = #tpu.dot_dimension_numbers<[2], [2], [1], [1], [0, 0, 0, 1, 1, 1], [0], [0]>} : vector<4x8x8xbf16>, vector<4x8x8xbf16>, vector<4x8x8xf32> -> vector<4x8x8xf32>
    "tpu.trace_stop"() : () -> ()
    %cst_87 = arith.constant 0.353553385 : f32
    %127 = vector.broadcast %cst_87 : f32 to vector<4x8x8xf32>
    %128 = arith.mulf %126, %127 : vector<4x8x8xf32>
    %129 = vector.shape_cast %16 : vector<8x8xf32> to vector<1x8x8xf32>
    %130 = vector.broadcast %129 : vector<1x8x8xf32> to vector<4x8x8xf32>
    %131 = arith.addf %128, %130 : vector<4x8x8xf32>
    %cst_88 = arith.constant dense<0xFF800000> : vector<4x8xf32>
    %132 = vector.multi_reduction <maximumf>, %131, %cst_88 [2] : vector<4x8x8xf32> to vector<4x8xf32>
    %133 = vector.shape_cast %132 : vector<4x8xf32> to vector<4x8x1xf32>
    %134 = vector.broadcast %133 : vector<4x8x1xf32> to vector<4x8x8xf32>
    %135 = arith.subf %131, %134 : vector<4x8x8xf32>
    %136 = math.exp %135 : vector<4x8x8xf32>
    %cst_89 = arith.constant dense<0.000000e+00> : vector<4x8xf32>
    %137 = vector.multi_reduction <add>, %136, %cst_89 [2] : vector<4x8x8xf32> to vector<4x8xf32>
    %138 = vector.shape_cast %137 : vector<4x8xf32> to vector<4x8x1xf32>
    %139 = tpu.reciprocal %138 {approx = true} : vector<4x8x1xf32> -> vector<4x8x1xf32>
    %140 = vector.broadcast %139 : vector<4x8x1xf32> to vector<4x8x8xf32>
    %141 = arith.mulf %136, %140 : vector<4x8x8xf32>
    %142 = arith.truncf %141 : vector<4x8x8xf32> to vector<4x8x8xbf16>
    %143 = arith.truncf %123 : vector<4x8x8xf32> to vector<4x8x8xbf16>
    "tpu.trace_start"() <{level = 10 : i32, message = "hqk,hkd->hqd"}> : () -> ()
    %cst_90 = arith.constant dense<0.000000e+00> : vector<4x8x8xf32>
    %144 = tpu.matmul %142, %143, %cst_90 {dimension_numbers = #tpu.dot_dimension_numbers<[2], [1], [1], [2], [0, 0, 0, 1, 1, 2], [0], [0]>} : vector<4x8x8xbf16>, vector<4x8x8xbf16>, vector<4x8x8xf32> -> vector<4x8x8xf32>
    "tpu.trace_stop"() : () -> ()
    %145 = arith.truncf %144 : vector<4x8x8xf32> to vector<4x8x8xbf16>
    %c0_91 = arith.constant 0 : index
    %c0_92 = arith.constant 0 : index
    %c0_93 = arith.constant 0 : index
    %c0_94 = arith.constant 0 : index
    %146 = vector.load %arg17[%c0_91, %c0_92, %c0_93, %c0_94] : memref<1x4x8x32xbf16, #tpu.memory_space<vmem>>, vector<1x4x8x32xbf16>
    %147 = vector.shape_cast %146 : vector<1x4x8x32xbf16> to vector<4x8x32xbf16>
    "tpu.trace_start"() <{level = 10 : i32, message = "hqd,hdk->hqk"}> : () -> ()
    %cst_95 = arith.constant dense<0.000000e+00> : vector<4x8x32xf32>
    %148 = tpu.matmul %145, %147, %cst_95 {dimension_numbers = #tpu.dot_dimension_numbers<[2], [1], [1], [2], [0, 0, 0, 1, 1, 2], [0], [0]>} : vector<4x8x8xbf16>, vector<4x8x32xbf16>, vector<4x8x32xf32> -> vector<4x8x32xf32>
    "tpu.trace_stop"() : () -> ()
    %cst_96 = arith.constant dense<0.000000e+00> : vector<8x32xf32>
    %149 = vector.multi_reduction <add>, %148, %cst_96 [0] : vector<4x8x32xf32> to vector<8x32xf32>
    %c0_97 = arith.constant 0 : index
    %c0_98 = arith.constant 0 : index
    %c0_99 = arith.constant 0 : index
    %150 = vector.load %arg18[%c0_97, %c0_98, %c0_99] : memref<1x1x32xf32, #tpu.memory_space<vmem>>, vector<1x1x32xf32>
    %151 = vector.shape_cast %150 : vector<1x1x32xf32> to vector<1x32xf32>
    %152 = vector.broadcast %151 : vector<1x32xf32> to vector<8x32xf32>
    %153 = arith.addf %149, %152 : vector<8x32xf32>
    %154 = arith.addf %98, %153 : vector<8x32xf32>
    %c0_100 = arith.constant 0 : index
    %c0_101 = arith.constant 0 : index
    %c0_102 = arith.constant 0 : index
    %155 = vector.load %arg21[%c0_100, %c0_101, %c0_102] : memref<1x1x32xf32, #tpu.memory_space<vmem>>, vector<1x1x32xf32>
    %156 = vector.shape_cast %155 : vector<1x1x32xf32> to vector<1x32xf32>
    %c0_103 = arith.constant 0 : index
    %c0_104 = arith.constant 0 : index
    %c0_105 = arith.constant 0 : index
    %157 = vector.load %arg22[%c0_103, %c0_104, %c0_105] : memref<1x1x32xf32, #tpu.memory_space<vmem>>, vector<1x1x32xf32>
    %158 = vector.shape_cast %157 : vector<1x1x32xf32> to vector<1x32xf32>
    %cst_106 = arith.constant dense<0.000000e+00> : vector<8xf32>
    %159 = vector.multi_reduction <add>, %154, %cst_106 [1] : vector<8x32xf32> to vector<8xf32>
    %160 = vector.shape_cast %159 : vector<8xf32> to vector<8x1xf32>
    %cst_107 = arith.constant 3.200000e+01 : f32
    %161 = vector.broadcast %cst_107 : f32 to vector<8x1xf32>
    %162 = arith.divf %160, %161 : vector<8x1xf32>
    %163 = vector.broadcast %162 : vector<8x1xf32> to vector<8x32xf32>
    %164 = arith.subf %154, %163 : vector<8x32xf32>
    %165 = arith.mulf %164, %164 : vector<8x32xf32>
    %cst_108 = arith.constant dense<0.000000e+00> : vector<8xf32>
    %166 = vector.multi_reduction <add>, %165, %cst_108 [1] : vector<8x32xf32> to vector<8xf32>
    %167 = vector.shape_cast %166 : vector<8xf32> to vector<8x1xf32>
    %cst_109 = arith.constant 3.200000e+01 : f32
    %168 = vector.broadcast %cst_109 : f32 to vector<8x1xf32>
    %169 = arith.divf %167, %168 : vector<8x1xf32>
    %170 = vector.broadcast %162 : vector<8x1xf32> to vector<8x32xf32>
    %171 = arith.subf %154, %170 : vector<8x32xf32>
    %cst_110 = arith.constant 9.99999974E-6 : f32
    %172 = vector.broadcast %cst_110 : f32 to vector<8x1xf32>
    %173 = arith.addf %169, %172 : vector<8x1xf32>
    %174 = math.rsqrt %173 : vector<8x1xf32>
    %175 = vector.broadcast %174 : vector<8x1xf32> to vector<8x32xf32>
    %176 = arith.mulf %171, %175 : vector<8x32xf32>
    %177 = vector.broadcast %156 : vector<1x32xf32> to vector<8x32xf32>
    %178 = arith.mulf %176, %177 : vector<8x32xf32>
    %179 = vector.broadcast %158 : vector<1x32xf32> to vector<8x32xf32>
    %180 = arith.addf %178, %179 : vector<8x32xf32>
    %181 = arith.truncf %180 : vector<8x32xf32> to vector<8x32xbf16>
    %c0_111 = arith.constant 0 : index
    %c0_112 = arith.constant 0 : index
    %c0_113 = arith.constant 0 : index
    %182 = vector.load %arg25[%c0_111, %c0_112, %c0_113] : memref<1x32x64xbf16, #tpu.memory_space<vmem>>, vector<1x32x64xbf16>
    %183 = vector.shape_cast %182 : vector<1x32x64xbf16> to vector<32x64xbf16>
    %cst_114 = arith.constant dense<0.000000e+00> : vector<8x64xf32>
    %184 = tpu.matmul %181, %183, %cst_114 {dimension_numbers = #tpu.dot_dimension_numbers<[1], [0], [0], [1], [0, 0, 1, 1], [], []>} : vector<8x32xbf16>, vector<32x64xbf16>, vector<8x64xf32> -> vector<8x64xf32>
    %c0_115 = arith.constant 0 : index
    %c0_116 = arith.constant 0 : index
    %c0_117 = arith.constant 0 : index
    %185 = vector.load %arg26[%c0_115, %c0_116, %c0_117] : memref<1x1x64xf32, #tpu.memory_space<vmem>>, vector<1x1x64xf32>
    %186 = vector.shape_cast %185 : vector<1x1x64xf32> to vector<1x64xf32>
    %187 = vector.broadcast %186 : vector<1x64xf32> to vector<8x64xf32>
    %188 = arith.addf %184, %187 : vector<8x64xf32>
    %cst_118 = arith.constant 0.000000e+00 : f32
    %189 = vector.broadcast %cst_118 : f32 to vector<8x64xf32>
    %190 = arith.maximumf %188, %189 : vector<8x64xf32>
    %191 = arith.truncf %190 : vector<8x64xf32> to vector<8x64xbf16>
    %c0_119 = arith.constant 0 : index
    %c0_120 = arith.constant 0 : index
    %c0_121 = arith.constant 0 : index
    %192 = vector.load %arg27[%c0_119, %c0_120, %c0_121] : memref<1x64x32xbf16, #tpu.memory_space<vmem>>, vector<1x64x32xbf16>
    %193 = vector.shape_cast %192 : vector<1x64x32xbf16> to vector<64x32xbf16>
    %cst_122 = arith.constant dense<0.000000e+00> : vector<8x32xf32>
    %194 = tpu.matmul %191, %193, %cst_122 {dimension_numbers = #tpu.dot_dimension_numbers<[1], [0], [0], [1], [0, 0, 1, 1], [], []>} : vector<8x64xbf16>, vector<64x32xbf16>, vector<8x32xf32> -> vector<8x32xf32>
    %c0_123 = arith.constant 0 : index
    %c0_124 = arith.constant 0 : index
    %c0_125 = arith.constant 0 : index
    %195 = vector.load %arg28[%c0_123, %c0_124, %c0_125] : memref<1x1x32xf32, #tpu.memory_space<vmem>>, vector<1x1x32xf32>
    %196 = vector.shape_cast %195 : vector<1x1x32xf32> to vector<1x32xf32>
    %197 = vector.broadcast %196 : vector<1x32xf32> to vector<8x32xf32>
    %198 = arith.addf %194, %197 : vector<8x32xf32>
    %199 = arith.addf %180, %198 : vector<8x32xf32>
    %c0_126 = arith.constant 0 : index
    %c0_127 = arith.constant 0 : index
    %c0_128 = arith.constant 0 : index
    %200 = vector.load %arg23[%c0_126, %c0_127, %c0_128] : memref<1x1x32xf32, #tpu.memory_space<vmem>>, vector<1x1x32xf32>
    %201 = vector.shape_cast %200 : vector<1x1x32xf32> to vector<1x32xf32>
    %c0_129 = arith.constant 0 : index
    %c0_130 = arith.constant 0 : index
    %c0_131 = arith.constant 0 : index
    %202 = vector.load %arg24[%c0_129, %c0_130, %c0_131] : memref<1x1x32xf32, #tpu.memory_space<vmem>>, vector<1x1x32xf32>
    %203 = vector.shape_cast %202 : vector<1x1x32xf32> to vector<1x32xf32>
    %cst_132 = arith.constant dense<0.000000e+00> : vector<8xf32>
    %204 = vector.multi_reduction <add>, %199, %cst_132 [1] : vector<8x32xf32> to vector<8xf32>
    %205 = vector.shape_cast %204 : vector<8xf32> to vector<8x1xf32>
    %cst_133 = arith.constant 3.200000e+01 : f32
    %206 = vector.broadcast %cst_133 : f32 to vector<8x1xf32>
    %207 = arith.divf %205, %206 : vector<8x1xf32>
    %208 = vector.broadcast %207 : vector<8x1xf32> to vector<8x32xf32>
    %209 = arith.subf %199, %208 : vector<8x32xf32>
    %210 = arith.mulf %209, %209 : vector<8x32xf32>
    %cst_134 = arith.constant dense<0.000000e+00> : vector<8xf32>
    %211 = vector.multi_reduction <add>, %210, %cst_134 [1] : vector<8x32xf32> to vector<8xf32>
    %212 = vector.shape_cast %211 : vector<8xf32> to vector<8x1xf32>
    %cst_135 = arith.constant 3.200000e+01 : f32
    %213 = vector.broadcast %cst_135 : f32 to vector<8x1xf32>
    %214 = arith.divf %212, %213 : vector<8x1xf32>
    %215 = vector.broadcast %207 : vector<8x1xf32> to vector<8x32xf32>
    %216 = arith.subf %199, %215 : vector<8x32xf32>
    %cst_136 = arith.constant 9.99999974E-6 : f32
    %217 = vector.broadcast %cst_136 : f32 to vector<8x1xf32>
    %218 = arith.addf %214, %217 : vector<8x1xf32>
    %219 = math.rsqrt %218 : vector<8x1xf32>
    %220 = vector.broadcast %219 : vector<8x1xf32> to vector<8x32xf32>
    %221 = arith.mulf %216, %220 : vector<8x32xf32>
    %222 = vector.broadcast %201 : vector<1x32xf32> to vector<8x32xf32>
    %223 = arith.mulf %221, %222 : vector<8x32xf32>
    %224 = vector.broadcast %203 : vector<1x32xf32> to vector<8x32xf32>
    %225 = arith.addf %223, %224 : vector<8x32xf32>
    %c0_137 = arith.constant 0 : index
    %c0_138 = arith.constant 0 : index
    %c0_139 = arith.constant 0 : index
    %226 = vector.load %arg29[%c0_137, %c0_138, %c0_139] : memref<1x8x32xf32, #tpu.memory_space<vmem>>, vector<1x8x32xf32>
    %227 = vector.shape_cast %226 : vector<1x8x32xf32> to vector<8x32xf32>
    %228 = vector.shape_cast %225 : vector<8x32xf32> to vector<1x8x32xf32>
    tpu.vector_store %arg29[%c0_137, %c0_138, %c0_139], %228 {strides = array<i32>} : memref<1x8x32xf32, #tpu.memory_space<vmem>>, vector<1x8x32xf32>,
    return
  }
  func.func @transform_0(%arg0: i32, %arg1: i32) -> (i32, i32, i32) {
    %c0_i32 = arith.constant 0 : i32
    %c0_i32_0 = arith.constant 0 : i32
    %c0_i32_1 = arith.constant 0 : i32
    return %arg0, %c0_i32, %c0_i32_0 : i32, i32, i32
  }
  func.func @transform_1(%arg0: i32, %arg1: i32) -> (i32, i32, i32, i32) {
    %c0_i32 = arith.constant 0 : i32
    %c0_i32_0 = arith.constant 0 : i32
    %c0_i32_1 = arith.constant 0 : i32
    %c0_i32_2 = arith.constant 0 : i32
    return %arg1, %c0_i32, %c0_i32_0, %c0_i32_1 : i32, i32, i32, i32
  }
  func.func @transform_2(%arg0: i32, %arg1: i32) -> (i32, i32, i32, i32) {
    %c0_i32 = arith.constant 0 : i32
    %c0_i32_0 = arith.constant 0 : i32
    %c0_i32_1 = arith.constant 0 : i32
    %c0_i32_2 = arith.constant 0 : i32
    return %arg1, %c0_i32, %c0_i32_0, %c0_i32_1 : i32, i32, i32, i32
  }
  func.func @transform_3(%arg0: i32, %arg1: i32) -> (i32, i32, i32, i32) {
    %c0_i32 = arith.constant 0 : i32
    %c0_i32_0 = arith.constant 0 : i32
    %c0_i32_1 = arith.constant 0 : i32
    %c0_i32_2 = arith.constant 0 : i32
    return %arg1, %c0_i32, %c0_i32_0, %c0_i32_1 : i32, i32, i32, i32
  }
  func.func @transform_4(%arg0: i32, %arg1: i32) -> (i32, i32, i32, i32) {
    %c0_i32 = arith.constant 0 : i32
    %c0_i32_0 = arith.constant 0 : i32
    %c0_i32_1 = arith.constant 0 : i32
    %c0_i32_2 = arith.constant 0 : i32
    return %arg1, %c0_i32, %c0_i32_0, %c0_i32_1 : i32, i32, i32, i32
  }
  func.func @transform_5(%arg0: i32, %arg1: i32) -> (i32, i32, i32, i32) {
    %c0_i32 = arith.constant 0 : i32
    %c0_i32_0 = arith.constant 0 : i32
    %c0_i32_1 = arith.constant 0 : i32
    %c0_i32_2 = arith.constant 0 : i32
    return %arg1, %c0_i32, %c0_i32_0, %c0_i32_1 : i32, i32, i32, i32
  }
  func.func @transform_6(%arg0: i32, %arg1: i32) -> (i32, i32, i32, i32) {
    %c0_i32 = arith.constant 0 : i32
    %c0_i32_0 = arith.constant 0 : i32
    %c0_i32_1 = arith.constant 0 : i32
    %c0_i32_2 = arith.constant 0 : i32
    return %arg1, %c0_i32, %c0_i32_0, %c0_i32_1 : i32, i32, i32, i32
  }
  func.func @transform_7(%arg0: i32, %arg1: i32) -> (i32, i32, i32, i32) {
    %c0_i32 = arith.constant 0 : i32
    %c0_i32_0 = arith.constant 0 : i32
    %c0_i32_1 = arith.constant 0 : i32
    %c0_i32_2 = arith.constant 0 : i32
    return %arg1, %c0_i32, %c0_i32_0, %c0_i32_1 : i32, i32, i32, i32
  }
  func.func @transform_8(%arg0: i32, %arg1: i32) -> (i32, i32, i32) {
    %c0_i32 = arith.constant 0 : i32
    %c0_i32_0 = arith.constant 0 : i32
    %c0_i32_1 = arith.constant 0 : i32
    return %arg1, %c0_i32, %c0_i32_0 : i32, i32, i32
  }
  func.func @transform_9(%arg0: i32, %arg1: i32) -> (i32, i32, i32, i32) {
    %c0_i32 = arith.constant 0 : i32
    %c0_i32_0 = arith.constant 0 : i32
    %c0_i32_1 = arith.constant 0 : i32
    %c0_i32_2 = arith.constant 0 : i32
    return %arg1, %c0_i32, %c0_i32_0, %c0_i32_1 : i32, i32, i32, i32
  }
  func.func @transform_10(%arg0: i32, %arg1: i32) -> (i32, i32, i32, i32) {
    %c0_i32 = arith.constant 0 : i32
    %c0_i32_0 = arith.constant 0 : i32
    %c0_i32_1 = arith.constant 0 : i32
    %c0_i32_2 = arith.constant 0 : i32
    return %arg1, %c0_i32, %c0_i32_0, %c0_i32_1 : i32, i32, i32, i32
  }
  func.func @transform_11(%arg0: i32, %arg1: i32) -> (i32, i32, i32, i32) {
    %c0_i32 = arith.constant 0 : i32
    %c0_i32_0 = arith.constant 0 : i32
    %c0_i32_1 = arith.constant 0 : i32
    %c0_i32_2 = arith.constant 0 : i32
    return %arg1, %c0_i32, %c0_i32_0, %c0_i32_1 : i32, i32, i32, i32
  }
  func.func @transform_12(%arg0: i32, %arg1: i32) -> (i32, i32, i32, i32) {
    %c0_i32 = arith.constant 0 : i32
    %c0_i32_0 = arith.constant 0 : i32
    %c0_i32_1 = arith.constant 0 : i32
    %c0_i32_2 = arith.constant 0 : i32
    return %arg1, %c0_i32, %c0_i32_0, %c0_i32_1 : i32, i32, i32, i32
  }
  func.func @transform_13(%arg0: i32, %arg1: i32) -> (i32, i32, i32, i32) {
    %c0_i32 = arith.constant 0 : i32
    %c0_i32_0 = arith.constant 0 : i32
    %c0_i32_1 = arith.constant 0 : i32
    %c0_i32_2 = arith.constant 0 : i32
    return %arg1, %c0_i32, %c0_i32_0, %c0_i32_1 : i32, i32, i32, i32
  }
  func.func @transform_14(%arg0: i32, %arg1: i32) -> (i32, i32, i32, i32) {
    %c0_i32 = arith.constant 0 : i32
    %c0_i32_0 = arith.constant 0 : i32
    %c0_i32_1 = arith.constant 0 : i32
    %c0_i32_2 = arith.constant 0 : i32
    return %arg1, %c0_i32, %c0_i32_0, %c0_i32_1 : i32, i32, i32, i32
  }
  func.func @transform_15(%arg0: i32, %arg1: i32) -> (i32, i32, i32, i32) {
    %c0_i32 = arith.constant 0 : i32
    %c0_i32_0 = arith.constant 0 : i32
    %c0_i32_1 = arith.constant 0 : i32
    %c0_i32_2 = arith.constant 0 : i32
    return %arg1, %c0_i32, %c0_i32_0, %c0_i32_1 : i32, i32, i32, i32
  }
  func.func @transform_16(%arg0: i32, %arg1: i32) -> (i32, i32, i32) {
    %c0_i32 = arith.constant 0 : i32
    %c0_i32_0 = arith.constant 0 : i32
    %c0_i32_1 = arith.constant 0 : i32
    return %arg1, %c0_i32, %c0_i32_0 : i32, i32, i32
  }
  func.func @transform_17(%arg0: i32, %arg1: i32) -> (i32, i32, i32) {
    %c0_i32 = arith.constant 0 : i32
    %c0_i32_0 = arith.constant 0 : i32
    %c0_i32_1 = arith.constant 0 : i32
    return %arg1, %c0_i32, %c0_i32_0 : i32, i32, i32
  }
  func.func @transform_18(%arg0: i32, %arg1: i32) -> (i32, i32, i32) {
    %c0_i32 = arith.constant 0 : i32
    %c0_i32_0 = arith.constant 0 : i32
    %c0_i32_1 = arith.constant 0 : i32
    return %arg1, %c0_i32, %c0_i32_0 : i32, i32, i32
  }
  func.func @transform_19(%arg0: i32, %arg1: i32) -> (i32, i32, i32) {
    %c0_i32 = arith.constant 0 : i32
    %c0_i32_0 = arith.constant 0 : i32
    %c0_i32_1 = arith.constant 0 : i32
    return %arg1, %c0_i32, %c0_i32_0 : i32, i32, i32
  }
  func.func @transform_20(%arg0: i32, %arg1: i32) -> (i32, i32, i32) {
    %c0_i32 = arith.constant 0 : i32
    %c0_i32_0 = arith.constant 0 : i32
    %c0_i32_1 = arith.constant 0 : i32
    return %arg1, %c0_i32, %c0_i32_0 : i32, i32, i32
  }
  func.func @transform_21(%arg0: i32, %arg1: i32) -> (i32, i32, i32) {
    %c0_i32 = arith.constant 0 : i32
    %c0_i32_0 = arith.constant 0 : i32
    %c0_i32_1 = arith.constant 0 : i32
    return %arg1, %c0_i32, %c0_i32_0 : i32, i32, i32
  }
  func.func @transform_22(%arg0: i32, %arg1: i32) -> (i32, i32, i32) {
    %c0_i32 = arith.constant 0 : i32
    %c0_i32_0 = arith.constant 0 : i32
    %c0_i32_1 = arith.constant 0 : i32
    return %arg1, %c0_i32, %c0_i32_0 : i32, i32, i32
  }
  func.func @transform_23(%arg0: i32, %arg1: i32) -> (i32, i32, i32) {
    %c0_i32 = arith.constant 0 : i32
    %c0_i32_0 = arith.constant 0 : i32
    %c0_i32_1 = arith.constant 0 : i32
    return %arg1, %c0_i32, %c0_i32_0 : i32, i32, i32
  }
  func.func @transform_24(%arg0: i32, %arg1: i32) -> (i32, i32, i32) {
    %c0_i32 = arith.constant 0 : i32
    %c0_i32_0 = arith.constant 0 : i32
    %c0_i32_1 = arith.constant 0 : i32
    return %arg1, %c0_i32, %c0_i32_0 : i32, i32, i32
  }
  func.func @transform_25(%arg0: i32, %arg1: i32) -> (i32, i32, i32) {
    %c0_i32 = arith.constant 0 : i32
    %c0_i32_0 = arith.constant 0 : i32
    %c0_i32_1 = arith.constant 0 : i32
    return %arg1, %c0_i32, %c0_i32_0 : i32, i32, i32
  }
  func.func @transform_26(%arg0: i32, %arg1: i32) -> (i32, i32, i32) {
    %c0_i32 = arith.constant 0 : i32
    %c0_i32_0 = arith.constant 0 : i32
    %c0_i32_1 = arith.constant 0 : i32
    return %arg1, %c0_i32, %c0_i32_0 : i32, i32, i32
  }
  func.func @transform_27(%arg0: i32, %arg1: i32) -> (i32, i32, i32) {
    %c0_i32 = arith.constant 0 : i32
    %c0_i32_0 = arith.constant 0 : i32
    %c0_i32_1 = arith.constant 0 : i32
    return %arg0, %c0_i32, %c0_i32_0 : i32, i32, i32
  }
}

</mosaic_0001>

<bundles_post_ra>
// kernel: tpu_custom_call.1
= control target key start
LH: loop header
LB: loop body
LE: loop exit
PB: predicated region body
PF: predicated region fallthrough
CT: control target
= control target key end

     0   :  { %s6524_s0 = inlined_call_operand.vmem [shape: f32[2,8,32], index: 0, kind: input, shape index: {}]   ;;  %s6525_s1 = inlined_call_operand.vmem [shape: bf16[2,4,32,8], index: 1, kind: input, shape index: {}]   ;;  %s6526_s2 = inlined_call_operand.vmem [shape: bf16[2,4,32,8], index: 2, kind: input, shape index: {}]   ;;  %s6527_s3 = inlined_call_operand.vmem [shape: bf16[2,4,32,8], index: 3, kind: input, shape index: {}]   ;;  %s6528_s4 = inlined_call_operand.vmem [shape: f32[2,4,1,8], index: 4, kind: input, shape index: {}]   ;;  %s6529_s5 = inlined_call_operand.vmem [shape: f32[2,4,1,8], index: 5, kind: input, shape index: {}]   ;;  %s6530_s6 = inlined_call_operand.vmem [shape: f32[2,4,1,8], index: 6, kind: input, shape index: {}]   ;;  %s6531_s7 = inlined_call_operand.vmem [shape: bf16[2,4,8,32], index: 7, kind: input, shape index: {}]   ;;  %s6532_s8 = inlined_call_operand.vmem [shape: f32[2,1,32], index: 8, kind: input, shape index: {}]   ;;  %s6533_s9 = inlined_call_operand.vmem [shape: bf16[2,4,32,8], index: 9, kind: input, shape index: {}]   ;;  %s6534_s10 = inlined_call_operand.vmem [shape: bf16[2,4,32,8], index: 10, kind: input, shape index: {}]   ;;  %s6535_s11 = inlined_call_operand.vmem [shape: bf16[2,4,32,8], index: 11, kind: input, shape index: {}]   ;;  %s6536_s12 = inlined_call_operand.vmem [shape: f32[2,4,1,8], index: 12, kind: input, shape index: {}]   ;;  %s6537_s13 = inlined_call_operand.vmem [shape: f32[2,4,1,8], index: 13, kind: input, shape index: {}]   ;;  %s6538_s14 = inlined_call_operand.vmem [shape: f32[2,4,1,8], index: 14, kind: input, shape index: {}]   ;;  %s6539_s15 = inlined_call_operand.vmem [shape: bf16[2,4,8,32], index: 15, kind: input, shape index: {}]   ;;  %s6540_s16 = inlined_call_operand.vmem [shape: f32[2,1,32], index: 16, kind: input, shape index: {}]   ;;  %s6541_s17 = inlined_call_operand.vmem [shape: f32[2,1,32], index: 17, kind: input, shape index: {}]   ;;  %s6542_s18 = inlined_call_operand.vmem [shape: f32[2,1,32], index: 18, kind: input, shape index: {}]   ;;  %s6543_s19 = inlined_call_operand.vmem [shape: f32[2,1,32], index: 19, kind: input, shape index: {}]   ;;  %s6544_s20 = inlined_call_operand.vmem [shape: f32[2,1,32], index: 20, kind: input, shape index: {}]   ;;  %s6545_s21 = inlined_call_operand.vmem [shape: f32[2,1,32], index: 21, kind: input, shape index: {}]   ;;  %s6546_s22 = inlined_call_operand.vmem [shape: f32[2,1,32], index: 22, kind: input, shape index: {}]   ;;  %s6547_s23 = inlined_call_operand.vmem [shape: bf16[2,32,64], index: 23, kind: input, shape index: {}]   ;;  %s6548_s24 = inlined_call_operand.vmem [shape: f32[2,1,64], index: 24, kind: input, shape index: {}]   ;;  %s6549_s25 = inlined_call_operand.vmem [shape: bf16[2,64,32], index: 25, kind: input, shape index: {}]   ;;  %s6550_s26 = inlined_call_operand.vmem [shape: f32[2,1,32], index: 26, kind: input, shape index: {}]   ;;  %s6551_s27 = inlined_call_operand.hbm [shape: f32[2,8,32], index: 27, kind: output, shape index: {}]  }
   0x1   :  { %6576 = sst [smem:[#allocation28_spill]] %s6524_s0 }
   0x2   :  { %6577 = sst [smem:[#allocation29_spill]] %s6525_s1 }
   0x3   :  { %6578 = sst [smem:[#allocation30_spill]] %s6526_s2 }
   0x4   :  { %6579 = sst [smem:[#allocation31_spill]] %s6527_s3 }
   0x5   :  { %6580 = sst [smem:[#allocation32_spill]] %s6528_s4 }
   0x6   :  { %6581 = sst [smem:[#allocation33_spill]] %s6529_s5 }
   0x7   :  { %6582 = sst [smem:[#allocation34_spill]] %s6530_s6 }
   0x8   :  { %6583 = sst [smem:[#allocation35_spill]] %s6531_s7 }
   0x9   :  { %6584 = sst [smem:[#allocation36_spill]] %s6532_s8 }
   0xa   :  { %6585 = sst [smem:[#allocation37_spill]] %s6533_s9 }
   0xb   :  { %6586 = sst [smem:[#allocation38_spill]] %s6534_s10 }
   0xc   :  { %6587 = sst [smem:[#allocation39_spill]] %s6535_s11 }
   0xd   :  { %6588 = sst [smem:[#allocation40_spill]] %s6536_s12 }
   0xe   :  { %6589 = sst [smem:[#allocation41_spill]] %s6537_s13 }
   0xf   :  { %6590 = sst [smem:[#allocation42_spill]] %s6538_s14 }
  0x10   :  { %6591 = sst [smem:[#allocation43_spill]] %s6539_s15 }
  0x11   :  { %6592 = sst [smem:[#allocation44_spill]] %s6540_s16 }
  0x12   :  { %6593 = sst [smem:[#allocation45_spill]] %s6543_s19 }
  0x13   :  { %6594 = sst [smem:[#allocation46_spill]] %s6544_s20 }
  0x14   :  { %6595 = sst [smem:[#allocation47_spill]] %s6545_s21 }
  0x15   :  { %6596 = sst [smem:[#allocation48_spill]] %s6546_s22 }
  0x16   :  { %6597 = sst [smem:[#allocation49_spill]] %s6547_s23 }
  0x17   :  { %6598 = sst [smem:[#allocation50_spill]] %s6548_s24 }
  0x18   :  { %6599 = sst [smem:[#allocation51_spill]] %s6549_s25 }
  0x19   :  { %6600 = sst [smem:[#allocation52_spill]] %s6550_s26 }
  0x1a   :  { %6601 = sst [smem:[#allocation53_spill]] %s6551_s27 }
  0x1b   :  { %32 = vsyncpa [#allocation3], 0 }
  0x1c   :  { %34 = vsyncpa [#allocation3 + $0x1], 0  ;;  %s5781_s7 = smov 0   ;;  %s5783_s4 = smov 0  }
  0x1d   :  { %s5785_s8 = smov 0   ;;  %s5787_s30 = smov 0  }
  0x1e   :  { %s5789_s9 = smov 0   ;;  %s5791_s5 = smov 0  }
  0x1f   :  { %s5793_s28 = smov 0   ;;  %s5795_s0 = smov 0  }
  0x20 LB: > { %6602 = sst [smem:[#allocation5_spill]] %s5608_s7  ;;  %s4707_s10 = sadd.s32 4294967295, %s5636_s0   ;;  %s5636_s0 = sphi %s5795_s0, %s40_s0   ;;  %s5632_s28 = sphi %s5793_s28, %s6694_s28   ;;  %s5628_s5 = sphi %s5791_s5, %s6693_s5   ;;  %s5624_s9 = sphi %s5789_s9, %s6692_s9   ;;  %s5620_s30 = sphi %s5787_s30, %s6691_s30   ;;  %s5616_s8 = sphi %s5785_s8, %s6690_s8   ;;  %s5612_s4 = sphi %s5783_s4, %s6689_s4   ;;  %s5608_s7 = sphi %s5781_s7, %s6688_s7  }
  0x21   : > { %6603 = sst [smem:[#allocation6_spill]] %s5612_s4  ;;  %s4708_s29 = sadd.s32 4294967294, %s5636_s0  }
  0x22   : > { %6604 = sst [smem:[#allocation7_spill]] %s5616_s8  ;;  %s49_s1 = sadd.s32 1, %s5628_s5 }
  0x23   : > { %6605 = sst [smem:[#allocation8_spill]] %s5620_s30  ;;  %p50_p0 = scmp.ge.s32.totalorder %s49_s1, 2 }
  0x24   : > { %6606 = sst [smem:[#allocation9_spill]] %s5624_s9  ;;  %s52_s6 = sadd.s32 1, %s5632_s28 }
  0x25   : > { %6607 = sst [smem:[#allocation10_spill]] %s5628_s5  ;;  %p771_p1 = scmp.ne.s32.totalorder %s5616_s8, %s5612_s4 }
  0x26   : > { %6608 = sst [smem:[#allocation11_spill]] %s5632_s28  ;;  %p772_p2 = scmp.eq.s32.totalorder %s4707_s10, 3 }
  0x27   : > { %6609 = sst [smem:[#allocation12_spill]] %s5636_s0  ;;  %s6696_s1 = smov (%p50_p0, %s49_s1), 0 }
  0x28   : > { %6610 = sst [smem:[#allocation13_spill]] %s6696_s1  ;;  %s6698_s6 = smov (!%p50_p0, %s52_s6), %s5632_s28 }
  0x29   : > { %p5830_p3 = por %p772_p2, %p771_p1  ;;  %p777_p4 = scmp.ne.s32.totalorder %s5612_s4, %s5608_s7 }
  0x2a   : > { %p54_p5 = scmp.ge.s32.totalorder %s6698_s6, 2  ;;  %p778_p6 = scmp.eq.s32.totalorder %s4708_s29, 3 }
  0x2b   : > { %s6611_s11 = scalar_select %p5830_p3, 1, 0 }
  0x2c   : > { %p4711_p7 = scmp.ge.s32.totalorder %s5636_s0, 1  ;;  %p985_p8 = scmp.lt.s32.totalorder %s5636_s0, 5 }
  0x2d   : > { %6612 = sst [smem:[#allocation14_spill]] %s6611_s11  ;;  %s6700_s6 = smov (%p54_p5, %s6698_s6), 0 }
  0x2e   : > { %6613 = sst [smem:[#allocation15_spill]] %s6700_s6  ;;  %p5840_p9 = por %p778_p6, %p777_p4 }
  0x2f   : > { %p986_p10 = pnand %p4711_p7, %p985_p8  ;;  %s758_s3 = ssub.s32 %s5632_s28, %s6700_s6 }
  0x30   : > { %s6614_s2 = scalar_select %p5840_p9, 1, 0 }
  0x31   : > { %s761_s10 = sadd.s32 1, %s5616_s8  ;;  %p759_p11 = scmp.eq.s32.totalorder %s758_s3, 0 }
  0x32   : > { %6615 = sst [smem:[#allocation16_spill]] %s6614_s2  ;;  %989 = sbr.rel (%p986_p10) target bundleno = 3940 (0xf64), region = 128 }
  0x33   : > { %s5848_s1 = scalar_select %p759_p11, %s5616_s8, %s761_s10  }
  0x35   : > { %6616 = sst [smem:[#allocation17_spill]] %s5848_s1 }
  0x39   : > { %s6563_s29 = sand.u32 1, %s5612_s4   ;;  %p1160_p12 = scmp.lt.s32.totalorder %s5624_s9, 1 }
  0x3a   : > { %s5854_s5 = sshll.u32 %s6563_s29, 3  ;;  %p1164_p13 = scmp.lt.s32.totalorder %s5620_s30, 1 }
  0x3b   : > { %s1161_s2 = scalar_select %p1160_p12, %s5624_s9, 1 }
  0x3c   : > { %s5859_s7 = scalar_select %p1164_p13, %s5620_s30, 1 }
  0x3d   : > { %s4713_s3 = sshll.u32 %s1161_s2, 3  ;;  %s6617_s28 = sld [smem:[#allocation28_spill]] }
  0x3e   : > { %s4883_s8 = sshll.u32 %s5859_s7, 6  ;;  %s6619_s11 = sld [smem:[#allocation29_spill]] }
  0x3f   : > { %s6621_s30 = sld [smem:[#allocation30_spill]]  ;;  %s6623_s23 = sld [smem:[#allocation31_spill]] }
  0x40   : > { %s6625_s10 = sld [smem:[#allocation32_spill]]  ;;  %s6629_s24 = sld [smem:[#allocation34_spill]] }
  0x41   : > { %s4886_s26 = sshll.u32 %s5859_s7, 4  ;;  %s6631_s6 = sld [smem:[#allocation35_spill]] }
  0x42   : > { %s6637_s12 = sld [smem:[#allocation40_spill]]  ;;  %s6639_s13 = sld [smem:[#allocation41_spill]] }
  0x43   : > { %s5864_s1 = scalar_lea.vmem %s6617_s28, %s4713_s3  ;;  %s4720_s28 = sshll.u32 %s5859_s7, 2 }
  0x44   : > { %6618 = sst [smem:[#allocation18_spill]] %s5864_s1  ;;  %s5870_s29 = scalar_lea.vmem %s6619_s11, %s4883_s8 }
  0x45   : > { %6620 = sst [smem:[#allocation19_spill]] %s5870_s29  ;;  %s5875_s25 = scalar_lea.vmem %s6621_s30, %s4883_s8 }
  0x46   : > { %6622 = sst [smem:[#allocation20_spill]] %s5875_s25  ;;  %s5880_s2 = scalar_lea.vmem %s6623_s23, %s4883_s8 }
  0x47   : > { %6624 = sst [smem:[#allocation21_spill]] %s5880_s2  ;;  %s5886_s27 = scalar_lea.vmem %s6625_s10, %s4720_s28 }
  0x48   : > { %6626 = sst [smem:[#allocation22_spill]] %s5886_s27  ;;  %s6627_s29 = sld [smem:[#allocation33_spill]] }
  0x49   : > { %s5896_s23 = scalar_lea.vmem %s6629_s24, %s4720_s28  ;;  %s5902_s3 = scalar_lea.vmem %s6631_s6, %s4886_s26 }
  0x4a   : > { %6630 = sst [smem:[#allocation24_spill]] %s5896_s23  ;;  %s6634_s1 = sld [smem:[#allocation37_spill]] }
  0x4b   : > { %6632 = sst [smem:[#allocation25_spill]] %s5902_s3  ;;  %s6635_s23 = sld [smem:[#allocation38_spill]] }
  0x4c   : > { %s6636_s6 = sld [smem:[#allocation39_spill]]  ;;  %s5926_s0 = scalar_lea.vmem %s6637_s12, %s4720_s28 }
  0x4d   : > { %6638 = sst [smem:[#allocation26_spill]] %s5926_s0  ;;  %s6640_s14 = sld [smem:[#allocation42_spill]] }
  0x4e   : > { %s5891_s4 = scalar_lea.vmem %s6627_s29, %s4720_s28  ;;  %s5931_s29 = scalar_lea.vmem %s6639_s13, %s4720_s28 }
  0x4f   : > { %6628 = sst [smem:[#allocation23_spill]] %s5891_s4  ;;  %s6641_s15 = sld [smem:[#allocation43_spill]] }
  0x50   : > { %s5911_s30 = scalar_lea.vmem %s6634_s1, %s4883_s8  ;;  %s6647_s12 = sld [smem:[#allocation48_spill]] }
  0x51   : > { %s5916_s22 = scalar_lea.vmem %s6635_s23, %s4883_s8  ;;  %s6648_s13 = sld [smem:[#allocation49_spill]] }
  0x52   : > { %s5921_s3 = scalar_lea.vmem %s6636_s6, %s4883_s8  ;;  %s4892_s19 = sshll.u32 %s5859_s7, 5 }
  0x53   : > { %s5936_s24 = scalar_lea.vmem %s6640_s14, %s4720_s28  ;;  %s6649_s28 = sld [smem:[#allocation50_spill]] }
  0x54   : > { %s6650_s2 = sld [smem:[#allocation52_spill]]  ;;  %s6651_s6 = sld [smem:[#allocation51_spill]] }
  0x55   : > { %s5941_s8 = scalar_lea.vmem %s6641_s15, %s4886_s26  ;;  %s5991_s10 = scalar_lea.vmem [#allocation2], %s5854_s5 }
  0x56   : > { %6642 = sst [smem:[#allocation27_spill]] %s5941_s8  ;;  %s1251_s11 = scalar_lea.vmem %s6647_s12, %s5859_s7 }
  0x57   : > { %s5974_s1 = scalar_lea.vmem %s6648_s13, %s4886_s26  ;;  %s6652_s27 = sld [smem:[#allocation8_spill]] }
  0x59   : > { %s1259_s23 = scalar_lea.vmem %s6649_s28, %s5859_s7 }
  0x5a   : > { %s1267_s20 = scalar_lea.vmem %s6650_s2, %s5859_s7  ;;  %s5988_s21 = scalar_lea.vmem %s6651_s6, %s4892_s19 }
  0x5d   : > { %p4740_p0 = scmp.ne.s32.totalorder %s6652_s27, 0 }
  0x5e   : > { %s6653_s16 = sld [smem:[#allocation18_spill]] (!%p4740_p0)  ;;  %vm1274_vm0 = vcmask (!%p4740_p0), 261120  }
  0x5f   : > { %1272 = sbr.rel (%p4740_p0) target bundleno = 102 (0x66), region = 132 }
  0x64   : > { %v1273_v0 = vld [vmem:[%s6653_s16] sm:$0xff] (!%p4740_p0) }
  0x65   : > { %1275 = vst.msk [vmem:[%s5991_s10] sm:$0xff] (!%p4740_p0), %vm1274_vm0, %v1273_v0 }
  0x66 PF: > { %s6654_s26 = sld [smem:[#allocation19_spill]]  ;;  %v5638_v2 = vmov 0.0   ;;  %vm5639_vm1 = vmmov 0   ;;  %vm1342_vm2 = vcmask 261120   ;;  %s6655_s19 = sld [smem:[#allocation20_spill]]  ;;  %vm2054_vm3 = vcmask 64512  }
  0x67   : > { %5021 = vmatprep.subr.bf16.mxu0 %v5638_v2  ;;  %5029 = vmatprep.subr.bf16.mxu1 %v5638_v2  ;;  %s6656_s5 = sld [smem:[#allocation21_spill]]  ;;  %s6657_s0 = sld [smem:[#allocation23_spill]]  ;;  %vm2302_vm4 = vcmask 1043456   ;;  %vm4266_vm6 = vcmask 523264  }
  0x68   : > { %5025 = vmatprep.mubr.msk.bf16.mxu0 %vm5639_vm1, %v5638_v2  ;;  %5033 = vmatprep.mubr.msk.bf16.mxu1 %vm5639_vm1, %v5638_v2  ;;  %s6658_s4 = sld [smem:[#allocation22_spill]]  ;;  %s6659_s2 = sld [smem:[#allocation24_spill]] }
  0x69   : > { %s6660_s6 = sld [smem:[#allocation25_spill]]  ;;  %s6661_s9 = sld [smem:[#allocation36_spill]] }
  0x6a   : > { %s6663_s15 = scalar_lea.vmem %s6541_s17, %s5859_s7  ;;  %s6664_s16 = scalar_lea.vmem %s6542_s18, %s5859_s7 }
  0x6b   : > { %s6672_s12 = sld [smem:[#allocation46_spill]] }
  0x6c   : > { %v5450_v1 = vld [vmem:[%s6654_s26] sm:$0xff]   ;;  %v5451_v3 = vld [vmem:[%s6654_s26 + $0x10] sm:$0xff]   ;;  %v5452_v4 = vld [vmem:[%s6654_s26 + $0x8] sm:$0xff]  }
  0x6d   : > { %5022 = vmatpush3.bf16.msra.mxu0 %v5450_v1  ;;  %5030 = vmatpush3.bf16.msra.mxu1 %v5451_v3  ;;  %v5453_v5 = vld [vmem:[%s6654_s26 + $0x18] sm:$0xff]   ;;  %v6009_v6 = vld [vmem:[%s5991_s10] sm:$0xff]  ;;  %v5455_v9 = vld [vmem:[%s6654_s26 + $0x30] sm:$0xff]  }
  0x6e   : > { %5023 = vmatprep.subr.bf16.mxu0 %v5638_v2  ;;  %5031 = vmatprep.subr.bf16.mxu1 %v5638_v2  ;;  %v6013_v7 = vpack.c.bf16 %v6009_v6, %v6009_v6  ;;  %v5454_v8 = vld [vmem:[%s6654_s26 + $0x20] sm:$0xff]   ;;  %v5456_v10 = vld [vmem:[%s6654_s26 + $0x28] sm:$0xff]   ;;  %v5457_v11 = vld [vmem:[%s6654_s26 + $0x38] sm:$0xff]   ;;  %s6665_s26 = sld [smem:[#allocation18_spill]] }
  0x6f   : > { %v5458_v12 = vld [vmem:[%s6655_s19] sm:$0xff]   ;;  %v5459_v13 = vld [vmem:[%s6655_s19 + $0x10] sm:$0xff]   ;;  %v5460_v14 = vld [vmem:[%s6655_s19 + $0x8] sm:$0xff]   ;;  %s6662_s28 = scalar_lea.vmem %s6661_s9, %s5859_s7 }
  0x70   : > { %v5461_v15 = vld [vmem:[%s6655_s19 + $0x18] sm:$0xff]   ;;  %v5462_v16 = vld [vmem:[%s6655_s19 + $0x20] sm:$0xff]   ;;  %v5463_v17 = vld [vmem:[%s6655_s19 + $0x30] sm:$0xff]  }
  0x71   : > { %5024 = vmatpush3.bf16.msra.mxu0 %v5452_v4  ;;  %5032 = vmatpush3.bf16.msra.mxu1 %v5453_v5  ;;  %v5464_v18 = vld [vmem:[%s6655_s19 + $0x28] sm:$0xff]   ;;  %v5465_v19 = vld [vmem:[%s6655_s19 + $0x38] sm:$0xff]   ;;  %v5466_v20 = vld [vmem:[%s6656_s5] sm:$0xff]   ;;  %s6673_s13 = scalar_lea.vmem %s6672_s12, %s5859_s7 }
  0x72   : > { %5037 = vmatprep.subr.bf16.mxu0 %v5638_v2  ;;  %5045 = vmatprep.subr.bf16.mxu1 %v5638_v2  ;;  %v5467_v21 = vld [vmem:[%s6656_s5 + $0x10] sm:$0xff]   ;;  %v5468_v22 = vld [vmem:[%s6656_s5 + $0x8] sm:$0xff]   ;;  %v5469_v23 = vld [vmem:[%s6656_s5 + $0x18] sm:$0xff]  }
  0x73   : > { %v5470_v24 = vld [vmem:[%s6656_s5 + $0x20] sm:$0xff]   ;;  %v5471_v25 = vld [vmem:[%s6656_s5 + $0x30] sm:$0xff]   ;;  %v5472_v26 = vld [vmem:[%s6656_s5 + $0x28] sm:$0xff]  }
  0x74   : > { %5026 = vmatmul.mubr.msk.bf16.vlgmr.msra.gmra.mrb[0].mxu0 %vm1342_vm2, %v6013_v7  ;;  %5034 = vmatmul.mubr.msk.bf16.vlgmr.msra.gmra.mrb[0].mxu1 %vm1342_vm2, %v6013_v7  ;;  %v5473_v27 = vld [vmem:[%s6656_s5 + $0x38] sm:$0xff]   ;;  %v4757_v44 = vld [vmem:[%s6657_s0] ss:$0 sm:$0xff]  ;;  %v4758_v45 = vld [vmem:[%s6657_s0 + $0x1] ss:$0 sm:$0xff] }
  0x75   : > { %5038 = vmatpush3.bf16.msra.mxu0 %v5454_v8  ;;  %5046 = vmatpush3.bf16.msra.mxu1 %v5455_v9  ;;  %v4741_v56 = vld [vmem:[%s6658_s4] ss:$0 sm:$0xff]  ;;  %v4742_v59 = vld [vmem:[%s6658_s4 + $0x1] ss:$0 sm:$0xff]  ;;  %v4759_v62 = vld [vmem:[%s6657_s0 + $0x2] ss:$0 sm:$0xff] }
  0x76   : > { %5039 = vmatprep.subr.bf16.mxu0 %v5638_v2  ;;  %5047 = vmatprep.subr.bf16.mxu1 %v5638_v2  ;;  %v4760_v0 = vld [vmem:[%s6657_s0 + $0x3] ss:$0 sm:$0xff]  ;;  %s6670_s0 = sld [smem:[#allocation45_spill]] }
  0x77   : > { %5041 = vmatprep.mubr.msk.bf16.mxu0 %vm5639_vm1, %v5638_v2  ;;  %5049 = vmatprep.mubr.msk.bf16.mxu1 %vm5639_vm1, %v5638_v2 }
  0x79   : > { %5040 = vmatpush3.bf16.msra.mxu0 %v5456_v10  ;;  %5048 = vmatpush3.bf16.msra.mxu1 %v5457_v11 }
  0x7a   : > { %5053 = vmatprep.subr.bf16.mxu0 %v5638_v2  ;;  %5061 = vmatprep.subr.bf16.mxu1 %v5638_v2 }
  0x7c   : > { %5042 = vmatmul.mubr.msk.bf16.vlgmr.msra.gmra.mrb[4].mxu0 %vm1342_vm2, %v6013_v7  ;;  %5050 = vmatmul.mubr.msk.bf16.vlgmr.msra.gmra.mrb[4].mxu1 %vm1342_vm2, %v6013_v7 }
  0x7d   : > { %5054 = vmatpush3.bf16.msra.mxu0 %v5458_v12  ;;  %5062 = vmatpush3.bf16.msra.mxu1 %v5459_v13 }
  0x7e   : > { %5055 = vmatprep.subr.bf16.mxu0 %v5638_v2  ;;  %5063 = vmatprep.subr.bf16.mxu1 %v5638_v2 }
  0x7f   : > { %5057 = vmatprep.mubr.msk.bf16.mxu0 %vm5639_vm1, %v5638_v2  ;;  %5065 = vmatprep.mubr.msk.bf16.mxu1 %vm5639_vm1, %v5638_v2 }
  0x81   : > { %5056 = vmatpush3.bf16.msra.mxu0 %v5460_v14  ;;  %5064 = vmatpush3.bf16.msra.mxu1 %v5461_v15 }
  0x82   : > { %5069 = vmatprep.subr.bf16.mxu0 %v5638_v2  ;;  %5077 = vmatprep.subr.bf16.mxu1 %v5638_v2 }
  0x84   : > { %5058 = vmatmul.mubr.msk.bf16.vlgmr.msra.gmra.mrb[8].mxu0 %vm1342_vm2, %v6013_v7  ;;  %5066 = vmatmul.mubr.msk.bf16.vlgmr.msra.gmra.mrb[8].mxu1 %vm1342_vm2, %v6013_v7 }
  0x85   : > { %5070 = vmatpush3.bf16.msra.mxu0 %v5462_v16  ;;  %5078 = vmatpush3.bf16.msra.mxu1 %v5463_v17  ;;  %v4743_v16 = vld [vmem:[%s6658_s4 + $0x2] ss:$0 sm:$0xff] }
  0x86   : > { %5071 = vmatprep.subr.bf16.mxu0 %v5638_v2  ;;  %5079 = vmatprep.subr.bf16.mxu1 %v5638_v2 }
  0x87   : > { %5073 = vmatprep.mubr.msk.bf16.mxu0 %vm5639_vm1, %v5638_v2  ;;  %5081 = vmatprep.mubr.msk.bf16.mxu1 %vm5639_vm1, %v5638_v2 }
  0x89   : > { %5072 = vmatpush3.bf16.msra.mxu0 %v5464_v18  ;;  %5080 = vmatpush3.bf16.msra.mxu1 %v5465_v19  ;;  %v4744_v19 = vld [vmem:[%s6658_s4 + $0x3] ss:$0 sm:$0xff]  ;;  %s6671_s4 = scalar_lea.vmem %s6670_s0, %s5859_s7  ;;  %s6682_s0 = sld [smem:[#allocation53_spill]] }
  0x8a   : > { %5085 = vmatprep.subr.bf16.mxu0 %v5638_v2  ;;  %5093 = vmatprep.subr.bf16.mxu1 %v5638_v2 }
  0x8c   : > { %5074 = vmatmul.mubr.msk.bf16.vlgmr.msra.gmra.mrb[12].mxu0 %vm1342_vm2, %v6013_v7  ;;  %5082 = vmatmul.mubr.msk.bf16.vlgmr.msra.gmra.mrb[12].mxu1 %vm1342_vm2, %v6013_v7 }
  0x8d   : > { %5086 = vmatpush3.bf16.msra.mxu0 %v5466_v20  ;;  %5089 = vmatprep.mubr.msk.bf16.mxu0 %vm5639_vm1, %v5638_v2 }
  0x8e   : > { %5087 = vmatprep.subr.bf16.mxu0 %v5638_v2  ;;  %5097 = vmatprep.mubr.msk.bf16.mxu1 %vm5639_vm1, %v5638_v2 }
  0x8f   : > { %5094 = vmatpush3.bf16.msra.mxu1 %v5467_v21 }
  0x90   : > { %5095 = vmatprep.subr.bf16.mxu1 %v5638_v2 }
  0x91   : > { %5088 = vmatpush3.bf16.msra.mxu0 %v5468_v22 }
  0x92   : > { %5101 = vmatprep.subr.bf16.mxu0 %v5638_v2 }
  0x93   : > { %5096 = vmatpush3.bf16.msra.mxu1 %v5469_v23 }
  0x94   : > { %5090 = vmatmul.mubr.msk.bf16.vlgmr.msra.gmra.mrb[16].mxu0 %vm1342_vm2, %v6013_v7  ;;  %5109 = vmatprep.subr.bf16.mxu1 %v5638_v2 }
  0x95   : > { %5105 = vmatprep.mubr.msk.bf16.mxu0 %vm5639_vm1, %v5638_v2  ;;  %5102 = vmatpush3.bf16.msra.mxu0 %v5470_v24 }
  0x96   : > { %5098 = vmatmul.mubr.msk.bf16.vlgmr.msra.gmra.mrb[16].mxu1 %vm1342_vm2, %v6013_v7  ;;  %5103 = vmatprep.subr.bf16.mxu0 %v5638_v2 }
  0x97   : > { %5110 = vmatpush3.bf16.msra.mxu1 %v5471_v25  ;;  %5113 = vmatprep.mubr.msk.bf16.mxu1 %vm5639_vm1, %v5638_v2 }
  0x98   : > { %5111 = vmatprep.subr.bf16.mxu1 %v5638_v2 }
  0x99   : > { %5104 = vmatpush3.bf16.msra.mxu0 %v5472_v26  ;;  %v4773_v26 = vld [vmem:[%s6659_s2] ss:$0 sm:$0xff] }
  0x9a   : > { %5117 = vmatprep.subr.bf16.mxu0 %v5638_v2 }
  0x9b   : > { %5112 = vmatpush3.bf16.msra.mxu1 %v5473_v27 }
  0x9c   : > { %5123 = vmatprep.subr.bf16.mxu1 %v5638_v2  ;;  %5106 = vmatmul.mubr.msk.bf16.vlgmr.msra.gmra.mrb[20].mxu0 %vm1342_vm2, %v6013_v7 }
  0x9d   : > { %5119 = vmatprep.mubr.msk.bf16.mxu0 %vm5639_vm1, %v5638_v2 }
  0x9e   : > { %5114 = vmatmul.mubr.msk.bf16.vlgmr.msra.gmra.mrb[20].mxu1 %vm1342_vm2, %v6013_v7 }
  0x9f   : > { %5125 = vmatprep.mubr.msk.bf16.mxu1 %vm5639_vm1, %v5638_v2 }
 0x147   : > { %v1380_v28 = vpop.f32.mrb[0].mxu0  ;;  %v1432_v30 = vpop.f32.mrb[0].mxu1 }
 0x148   : > { %v5027_v29 = vpop.f32.mrb[1].mxu0  ;;  %v5035_v32 = vpop.f32.mrb[1].mxu1  ;;  %v1381_v63 = vadd.f32 %v4741_v56, %v1380_v28  ;;  %v1433_v1 = vadd.f32 %v4742_v59, %v1432_v30  ;;  %v4774_v28 = vld [vmem:[%s6659_s2 + $0x1] ss:$0 sm:$0xff] }
 0x149   : > { %v1383_v31 = vpop.f32.mrb[2].mxu0  ;;  %v1435_v34 = vpop.f32.mrb[2].mxu1 }
 0x14a   : > { %v5028_v33 = vpop.f32.mrb[3].mxu0  ;;  %v5036_v35 = vpop.f32.mrb[3].mxu1  ;;  %v2046_v11 = vpack.c.bf16 %v1381_v63, %v1381_v63  ;;  %v2047_v15 = vpack.c.bf16 %v1433_v1, %v1433_v1 }
 0x14f   : > { %v1484_v36 = vpop.f32.mrb[4].mxu0  ;;  %v1536_v38 = vpop.f32.mrb[4].mxu1 }
 0x150   : > { %v5043_v37 = vpop.f32.mrb[5].mxu0  ;;  %v5051_v40 = vpop.f32.mrb[5].mxu1  ;;  %v1485_v22 = vadd.f32 %v4743_v16, %v1484_v36  ;;  %v1537_v23 = vadd.f32 %v4744_v19, %v1536_v38 }
 0x151   : > { %v1487_v39 = vpop.f32.mrb[6].mxu0  ;;  %v1539_v42 = vpop.f32.mrb[6].mxu1 }
 0x152   : > { %v5044_v41 = vpop.f32.mrb[7].mxu0  ;;  %v5052_v43 = vpop.f32.mrb[7].mxu1  ;;  %v2048_v24 = vpack.c.bf16 %v1485_v22, %v1485_v22  ;;  %v2049_v25 = vpack.c.bf16 %v1537_v23, %v1537_v23 }
 0x157   : > { %v1632_v46 = vpop.f32.mrb[8].mxu0  ;;  %v1684_v48 = vpop.f32.mrb[8].mxu1 }
 0x158   : > { %v1633_v47 = vadd.f32 %v4757_v44, %v1632_v46  ;;  %v5059_v49 = vpop.f32.mrb[9].mxu0  ;;  %v1685_v50 = vadd.f32 %v4758_v45, %v1684_v48  ;;  %v5067_v52 = vpop.f32.mrb[9].mxu1 }
 0x159   : > { %v1635_v51 = vpop.f32.mrb[10].mxu0  ;;  %v1687_v55 = vpop.f32.mrb[10].mxu1 }
 0x15a   : > { %v2050_v53 = vpack.c.bf16 %v1633_v47, %v1633_v47  ;;  %v5060_v54 = vpop.f32.mrb[11].mxu0  ;;  %v2051_v57 = vpack.c.bf16 %v1685_v50, %v1685_v50  ;;  %v5068_v58 = vpop.f32.mrb[11].mxu1  ;;  %v1279_v50 = vlaneseq }
 0x15c   : > { %v2059_v60 = vsel %vm2054_vm3, %v2050_v53, 0  ;;  %v2105_v61 = vsel %vm2054_vm3, %v2051_v57, 0  ;;  %v1280_v51 = vshrl.u32 %v1279_v50, 7  ;;  %v1282_v52 = vand.u32 127, %v1279_v50 }
 0x15d   : > { %5118 = vmatpush3.bf16.xpose.msra.mxu0 %v2059_v60  ;;  %5124 = vmatpush3.bf16.xpose.msra.mxu1 %v2105_v61 }
 0x15e   : > { %5129 = vmatprep.subr.bf16.mxu0 %v5638_v2  ;;  %5135 = vmatprep.subr.bf16.mxu1 %v5638_v2  ;;  %vm1283_vm5 = vcmp.gt.s32.totalorder %v1282_v52, %v1280_v51 }
 0x15f   : > { %v1736_v3 = vpop.f32.mrb[12].mxu0  ;;  %v1788_v5 = vpop.f32.mrb[12].mxu1  ;;  %v6144_v54 = vsel %vm1283_vm5, -1e+30, %v5638_v2 }
 0x160   : > { %v1737_v4 = vadd.f32 %v4759_v62, %v1736_v3  ;;  %v5075_v7 = vpop.f32.mrb[13].mxu0  ;;  %v1789_v8 = vadd.f32 %v4760_v0, %v1788_v5  ;;  %v5083_v10 = vpop.f32.mrb[13].mxu1 }
 0x161   : > { %v1739_v9 = vpop.f32.mrb[14].mxu0  ;;  %v1791_v14 = vpop.f32.mrb[14].mxu1 }
 0x162   : > { %v2052_v12 = vpack.c.bf16 %v1737_v4, %v1737_v4  ;;  %v5076_v13 = vpop.f32.mrb[15].mxu0  ;;  %v2053_v17 = vpack.c.bf16 %v1789_v8, %v1789_v8  ;;  %v5084_v18 = vpop.f32.mrb[15].mxu1 }
 0x164   : > { %v2151_v20 = vsel %vm2054_vm3, %v2052_v12, 0  ;;  %5120 = vmatmul.mubr.msk.bf16.vlgmr.msra.gmra.mrb[24].mxu0 %vm2054_vm3, %v2046_v11  ;;  %v2197_v21 = vsel %vm2054_vm3, %v2053_v17, 0  ;;  %5126 = vmatmul.mubr.msk.bf16.vlgmr.msra.gmra.mrb[24].mxu1 %vm2054_vm3, %v2047_v15 }
 0x165   : > { %5130 = vmatpush3.bf16.xpose.msra.mxu0 %v2151_v20  ;;  %5136 = vmatpush3.bf16.xpose.msra.mxu1 %v2197_v21 }
 0x166   : > { %5131 = vmatprep.mubr.msk.bf16.mxu0 %vm5639_vm1, %v5638_v2  ;;  %5137 = vmatprep.mubr.msk.bf16.mxu1 %vm5639_vm1, %v5638_v2 }
 0x167   : > { %5141 = vmatprep.subr.bf16.mxu0 %v5638_v2  ;;  %5147 = vmatprep.subr.bf16.mxu1 %v5638_v2  ;;  %v1884_v27 = vpop.f32.mrb[16].mxu0 }
 0x168   : > { %v1885_v29 = vadd.f32 %v4773_v26, %v1884_v27  ;;  %v5091_v30 = vpop.f32.mrb[17].mxu0 }
 0x169   : > { %v1887_v31 = vpop.f32.mrb[18].mxu0  ;;  %v1936_v32 = vpop.f32.mrb[16].mxu1 }
 0x16a   : > { %v2295_v33 = vpack.c.bf16 %v1885_v29, %v1885_v29  ;;  %v5092_v34 = vpop.f32.mrb[19].mxu0  ;;  %v1937_v35 = vadd.f32 %v4774_v28, %v1936_v32  ;;  %v5099_v36 = vpop.f32.mrb[17].mxu1 }
 0x16b   : > { %v1939_v37 = vpop.f32.mrb[18].mxu1 }
 0x16c   : > { %5132 = vmatmul.mubr.msk.bf16.vlgmr.msra.gmra.mrb[28].mxu0 %vm2054_vm3, %v2048_v24  ;;  %5138 = vmatmul.mubr.msk.bf16.vlgmr.msra.gmra.mrb[28].mxu1 %vm2054_vm3, %v2049_v25  ;;  %v2304_v38 = vsel %vm2302_vm4, %v2295_v33, 0  ;;  %v2296_v39 = vpack.c.bf16 %v1937_v35, %v1937_v35  ;;  %v5100_v40 = vpop.f32.mrb[19].mxu1 }
 0x16d   : > { %5143 = vmatprep.mubr.msk.bf16.mxu0 %vm5639_vm1, %v5638_v2  ;;  %5149 = vmatprep.mubr.msk.bf16.mxu1 %vm5639_vm1, %v5638_v2 }
 0x16e   : > { %5142 = vmatpush3.bf16.msra.mxu0 %v2304_v38  ;;  %v2350_v41 = vsel %vm2302_vm4, %v2296_v39, 0 }
 0x16f   : > { %5153 = vmatprep.subr.bf16.mxu0 %v5638_v2  ;;  %5148 = vmatpush3.bf16.msra.mxu1 %v2350_v41  ;;  %v6139_v42 = vpop.f32.mrb[20].mxu0 }
 0x170   : > { %5159 = vmatprep.subr.bf16.mxu1 %v5638_v2  ;;  %v5107_v44 = vpop.f32.mrb[21].mxu0 }
 0x171   : > { %v6141_v43 = vpop.f32.mrb[20].mxu1  ;;  %v1991_v46 = vpop.f32.mrb[22].mxu0  ;;  %v4775_v44 = vld [vmem:[%s6659_s2 + $0x2] ss:$0 sm:$0xff] }
 0x172   : > { %v5115_v45 = vpop.f32.mrb[21].mxu1  ;;  %v5108_v48 = vpop.f32.mrb[23].mxu0 }
 0x173   : > { %v2043_v47 = vpop.f32.mrb[22].mxu1  ;;  %v1989_v45 = vadd.f32 %v4775_v44, %v6139_v42 }
 0x174   : > { %v5116_v49 = vpop.f32.mrb[23].mxu1  ;;  %v4776_v47 = vld [vmem:[%s6659_s2 + $0x3] ss:$0 sm:$0xff]  ;;  %s6683_s2 = smov %s6682_s0 }
 0x175   : > { %v2297_v49 = vpack.c.bf16 %v1989_v45, %v1989_v45  ;;  %v2041_v50 = vadd.f32 %v4776_v47, %v6141_v43  ;;  %v2488_v43 = vld [vmem:[%s6660_s6] sm:$0xf] }
 0x237   : > { %v2095_v53 = vpop.f32.mrb[24].mxu0  ;;  %v2141_v56 = vpop.f32.mrb[24].mxu1 }
 0x238   : > { %v2239_v55 = vmul.f32 0.35355338, %v2095_v53  ;;  %v5121_v57 = vpop.f32.mrb[25].mxu0  ;;  %v2240_v58 = vmul.f32 0.35355338, %v2141_v56  ;;  %v5127_v59 = vpop.f32.mrb[25].mxu1 }
 0x239   : > { %v2098_v60 = vpop.f32.mrb[26].mxu0  ;;  %v2144_v61 = vpop.f32.mrb[26].mxu1  ;;  %v2396_v56 = vsel %vm2302_vm4, %v2297_v49, 0  ;;  %v2298_v57 = vpack.c.bf16 %v2041_v50, %v2041_v50 }
 0x23a   : > { %v5122_v62 = vpop.f32.mrb[27].mxu0  ;;  %v2243_v63 = vadd.f32 %v2239_v55, %v6144_v54  ;;  %v5128_v0 = vpop.f32.mrb[27].mxu1  ;;  %v2244_v3 = vadd.f32 %v2240_v58, %v6144_v54 }
 0x23b   : > { %v2442_v60 = vsel %vm2302_vm4, %v2298_v57, 0 }
 0x23c   : > { %v2247_v1 = vsel %vm2054_vm3, %v2243_v63, -inf  ;;  %v2250_v9 = vsel %vm2054_vm3, %v2244_v3, -inf }
 0x23d   : > { %2248 = vmax.xlane.f32.xlu0 %v2247_v1 }
 0x23f   : > { %v2187_v4 = vpop.f32.mrb[28].mxu0  ;;  %v2233_v7 = vpop.f32.mrb[28].mxu1 }
 0x240   : > { %v2241_v5 = vmul.f32 0.35355338, %v2187_v4  ;;  %v5133_v8 = vpop.f32.mrb[29].mxu0  ;;  %v2242_v10 = vmul.f32 0.35355338, %v2233_v7  ;;  %v5139_v11 = vpop.f32.mrb[29].mxu1 }
 0x241   : > { %2251 = vmax.xlane.f32.xlu0 %v2250_v9  ;;  %v2190_v12 = vpop.f32.mrb[30].mxu0  ;;  %v2236_v13 = vpop.f32.mrb[30].mxu1  ;;  %v2489_v4 = vld [vmem:[%s6660_s6 + $0x4] sm:$0xf]  ;;  %v2490_v7 = vld [vmem:[%s6660_s6 + $0x8] sm:$0xf] }
 0x242   : > { %v5134_v14 = vpop.f32.mrb[31].mxu0  ;;  %v2245_v15 = vadd.f32 %v2241_v5, %v6144_v54  ;;  %v5140_v16 = vpop.f32.mrb[31].mxu1  ;;  %v2246_v18 = vadd.f32 %v2242_v10, %v6144_v54  ;;  %v2542_v5 = vsel %vm2302_vm4, %v2489_v4, 0  ;;  %v2588_v11 = vsel %vm2302_vm4, %v2490_v7, 0  ;;  %v2491_v13 = vld [vmem:[%s6660_s6 + $0xc] sm:$0xf] }
 0x243   : > { %v5477_v4 = vld [vmem:[%s5911_s30 + $0x18] sm:$0xff]  }
 0x244   : > { %v2253_v17 = vsel %vm2054_vm3, %v2245_v15, -inf  ;;  %v2256_v19 = vsel %vm2054_vm3, %v2246_v18, -inf }
 0x245   : > { %2254 = vmax.xlane.f32.xlu1 %v2253_v17 }
 0x249   : > { %2257 = vmax.xlane.f32.xlu1 %v2256_v19 }
 0x2ca   : > { %v2249_v20 = vpop.xlane.xlu0 %2248 }
 0x2cb   : > { %v2259_v21 = vsub.f32 %v2243_v63, %v2249_v20  ;;  %v2496_v63 = vsel %vm2302_vm4, %v2488_v43, 0 }
 0x2cd   : > { %v2263_v22 = vmul.f32 1.442695, %v2259_v21 }
 0x2ce   : > { %v2252_v23 = vpop.xlane.xlu0 %2251 }
 0x2cf   : > { %5504 = vpow2.f32 %v2263_v22  ;;  %v2260_v24 = vsub.f32 %v2244_v3, %v2252_v23 }
 0x2d1   : > { %v2265_v25 = vmul.f32 1.442695, %v2260_v24 }
 0x2d2   : > { %v2255_v26 = vpop.xlane.xlu1 %2254 }
 0x2d3   : > { %5506 = vpow2.f32 %v2265_v25  ;;  %v2261_v27 = vsub.f32 %v2245_v15, %v2255_v26 }
 0x2d5   : > { %v2267_v28 = vmul.f32 1.442695, %v2261_v27 }
 0x2d6   : > { %v2258_v29 = vpop.xlane.xlu1 %2257 }
 0x2d7   : > { %5508 = vpow2.f32 %v2267_v28  ;;  %v2262_v30 = vsub.f32 %v2246_v18, %v2258_v29  ;;  %v2634_v18 = vsel %vm2302_vm4, %v2491_v13, 0 }
 0x2d9   : > { %v5505_v31 = vpop.eup %5504  ;;  %v2269_v32 = vmul.f32 1.442695, %v2262_v30 }
 0x2da   : > { %v2271_v33 = vsel %vm2054_vm3, %v5505_v31, 0.0 }
 0x2db   : > { %5510 = vpow2.f32 %v2269_v32  ;;  %2272 = vadd.xlane.f32.xlu0 %v2271_v33 }
 0x2dd   : > { %v5507_v34 = vpop.eup %5506 }
 0x2de   : > { %v2274_v35 = vsel %vm2054_vm3, %v5507_v34, 0.0 }
 0x2df   : > { %2275 = vadd.xlane.f32.xlu1 %v2274_v35 }
 0x2e1   : > { %v5509_v36 = vpop.eup %5508 }
 0x2e2   : > { %v2277_v37 = vsel %vm2054_vm3, %v5509_v36, 0.0 }
 0x2e3   : > { %2278 = vadd.xlane.f32.xlu0 %v2277_v37 }
 0x2e5   : > { %v5511_v38 = vpop.eup %5510 }
 0x2e6   : > { %v2280_v39 = vsel %vm2054_vm3, %v5511_v38, 0.0 }
 0x2e7   : > { %2281 = vadd.xlane.f32.xlu1 %v2280_v39 }
 0x368   : > { %v2273_v40 = vpop.xlane.xlu0 %2272 }
 0x369   : > { %5512 = vrcp.f32 %v2273_v40 }
 0x36c   : > { %v2276_v41 = vpop.xlane.xlu1 %2275 }
 0x36d   : > { %5514 = vrcp.f32 %v2276_v41 }
 0x370   : > { %v2279_v46 = vpop.xlane.xlu0 %2278 }
 0x371   : > { %5516 = vrcp.f32 %v2279_v46 }
 0x373   : > { %v5513_v48 = vpop.eup %5512 }
 0x374   : > { %v2287_v51 = vmul.f32 %v5513_v48, %v5505_v31  ;;  %v2282_v52 = vpop.xlane.xlu1 %2281 }
 0x375   : > { %5518 = vrcp.f32 %v2282_v52  ;;  %v4801_v52 = vld [vmem:[%s6662_s28] ss:$0 sm:$0xff] }
 0x376   : > { %v2291_v53 = vpack.c.bf16 %v2287_v51, %v2287_v51 }
 0x377   : > { %v5515_v55 = vpop.eup %5514 }
 0x378   : > { %v2288_v58 = vmul.f32 %v5515_v55, %v5507_v34  ;;  %5144 = vmatmul.mubr.msk.bf16.vlgmr.msra.gmra.mrb[32].mxu0 %vm2054_vm3, %v2291_v53 }
 0x379   : > { %5154 = vmatpush3.bf16.msra.mxu0 %v2396_v56  ;;  %5155 = vmatprep.mubr.msk.bf16.mxu0 %vm5639_vm1, %v5638_v2 }
 0x37a   : > { %v2292_v42 = vpack.c.bf16 %v2288_v58, %v2288_v58  ;;  %5165 = vmatprep.subr.bf16.mxu0 %v5638_v2 }
 0x37b   : > { %v5517_v59 = vpop.eup %5516 }
 0x37c   : > { %v2289_v61 = vmul.f32 %v5517_v59, %v5509_v36  ;;  %5150 = vmatmul.mubr.msk.bf16.vlgmr.msra.gmra.mrb[32].mxu1 %vm2054_vm3, %v2292_v42 }
 0x37d   : > { %5160 = vmatpush3.bf16.msra.mxu1 %v2442_v60  ;;  %5161 = vmatprep.mubr.msk.bf16.mxu1 %vm5639_vm1, %v5638_v2 }
 0x37e   : > { %v2293_v62 = vpack.c.bf16 %v2289_v61, %v2289_v61  ;;  %5171 = vmatprep.subr.bf16.mxu1 %v5638_v2 }
 0x37f   : > { %v5519_v0 = vpop.eup %5518 }
 0x380   : > { %v2290_v1 = vmul.f32 %v5519_v0, %v5511_v38  ;;  %5156 = vmatmul.mubr.msk.bf16.vlgmr.msra.gmra.mrb[36].mxu0 %vm2054_vm3, %v2293_v62  ;;  %v5474_v0 = vld [vmem:[%s5911_s30] sm:$0xff]  }
 0x381   : > { %5166 = vmatpush3.bf16.msra.mxu0 %v2496_v63  ;;  %5167 = vmatprep.mubr.msk.bf16.mxu0 %vm5639_vm1, %v5638_v2 }
 0x382   : > { %v2294_v3 = vpack.c.bf16 %v2290_v1, %v2290_v1  ;;  %5177 = vmatprep.subr.bf16.mxu0 %v5638_v2  ;;  %v5475_v1 = vld [vmem:[%s5911_s30 + $0x10] sm:$0xff]  }
 0x384   : > { %5162 = vmatmul.mubr.msk.bf16.vlgmr.msra.gmra.mrb[36].mxu1 %vm2054_vm3, %v2294_v3  ;;  %v5476_v3 = vld [vmem:[%s5911_s30 + $0x8] sm:$0xff]  }
 0x385   : > { %5173 = vmatprep.mubr.msk.bf16.mxu1 %vm5639_vm1, %v5638_v2  ;;  %5172 = vmatpush3.bf16.msra.mxu1 %v2542_v5 }
 0x386   : > { %5183 = vmatprep.subr.bf16.mxu1 %v5638_v2 }
 0x44b   : > { %v2340_v8 = vpop.f32.mrb[32].mxu0 }
 0x44c   : > { %v2484_v9 = vpack.c.bf16 %v2340_v8, %v2340_v8  ;;  %v5145_v10 = vpop.f32.mrb[33].mxu0 }
 0x44d   : > { %v2343_v12 = vpop.f32.mrb[34].mxu0 }
 0x44e   : > { %v5146_v14 = vpop.f32.mrb[35].mxu0  ;;  %5168 = vmatmul.mubr.msk.bf16.vlgmr.msra.gmra.mrb[40].mxu0 %vm2054_vm3, %v2484_v9  ;;  %v4802_v9 = vld [vmem:[%s6663_s15] ss:$0 sm:$0xff] }
 0x44f   : > { %v2386_v15 = vpop.f32.mrb[32].mxu1  ;;  %5178 = vmatpush3.bf16.msra.mxu0 %v2588_v11  ;;  %5179 = vmatprep.mubr.msk.bf16.mxu0 %vm5639_vm1, %v5638_v2  ;;  %v4803_v11 = vld [vmem:[%s6664_s16] ss:$0 sm:$0xff] }
 0x450   : > { %v2485_v16 = vpack.c.bf16 %v2386_v15, %v2386_v15  ;;  %v5151_v17 = vpop.f32.mrb[33].mxu1  ;;  %5189 = vmatprep.subr.bf16.mxu0 %v5638_v2  ;;  %v5478_v14 = vld [vmem:[%s5911_s30 + $0x20] sm:$0xff]   ;;  %v5479_v15 = vld [vmem:[%s5911_s30 + $0x30] sm:$0xff]  }
 0x451   : > { %v2389_v19 = vpop.f32.mrb[34].mxu1  ;;  %v5480_v17 = vld [vmem:[%s5911_s30 + $0x28] sm:$0xff]  }
 0x452   : > { %v5152_v20 = vpop.f32.mrb[35].mxu1  ;;  %5174 = vmatmul.mubr.msk.bf16.vlgmr.msra.gmra.mrb[40].mxu1 %vm2054_vm3, %v2485_v16  ;;  %v5482_v19 = vld [vmem:[%s5916_s22] sm:$0xff]  }
 0x453   : > { %v2432_v21 = vpop.f32.mrb[36].mxu0  ;;  %5184 = vmatpush3.bf16.msra.mxu1 %v2634_v18  ;;  %5185 = vmatprep.mubr.msk.bf16.mxu1 %vm5639_vm1, %v5638_v2  ;;  %v5481_v18 = vld [vmem:[%s5911_s30 + $0x38] sm:$0xff]   ;;  %v5483_v20 = vld [vmem:[%s5916_s22 + $0x10] sm:$0xff]  }
 0x454   : > { %v2486_v22 = vpack.c.bf16 %v2432_v21, %v2432_v21  ;;  %v5157_v23 = vpop.f32.mrb[37].mxu0  ;;  %5197 = vmatprep.subr.bf16.mxu1 %v5638_v2  ;;  %v5484_v21 = vld [vmem:[%s5916_s22 + $0x8] sm:$0xff]  }
 0x455   : > { %v2435_v24 = vpop.f32.mrb[38].mxu0  ;;  %v1277_v23 = vld [vmem:[%s6665_s26] sm:$0xff]  ;;  %s6679_s26 = sld [smem:[#allocation47_spill]] }
 0x456   : > { %v5158_v25 = vpop.f32.mrb[39].mxu0  ;;  %5180 = vmatmul.mubr.msk.bf16.vlgmr.msra.gmra.mrb[44].mxu0 %vm2054_vm3, %v2486_v22  ;;  %v5485_v22 = vld [vmem:[%s5916_s22 + $0x18] sm:$0xff]   ;;  %v1278_v24 = vpack.c.bf16 %v1277_v23, %v1277_v23 }
 0x457   : > { %v2478_v26 = vpop.f32.mrb[36].mxu1  ;;  %5193 = vmatprep.mubr.msk.bf16.mxu0 %vm5639_vm1, %v5638_v2  ;;  %5190 = vmatpush3.bf16.msra.mxu0 %v5474_v0  ;;  %v5486_v25 = vld [vmem:[%s5916_s22 + $0x20] sm:$0xff]  }
 0x458   : > { %v2487_v27 = vpack.c.bf16 %v2478_v26, %v2478_v26  ;;  %v5163_v28 = vpop.f32.mrb[37].mxu1  ;;  %5191 = vmatprep.subr.bf16.mxu0 %v5638_v2  ;;  %v5487_v26 = vld [vmem:[%s5916_s22 + $0x30] sm:$0xff]  }
 0x459   : > { %v2481_v29 = vpop.f32.mrb[38].mxu1  ;;  %v5489_v28 = vld [vmem:[%s5916_s22 + $0x38] sm:$0xff]  }
 0x45a   : > { %v5164_v30 = vpop.f32.mrb[39].mxu1  ;;  %5186 = vmatmul.mubr.msk.bf16.vlgmr.msra.gmra.mrb[44].mxu1 %vm2054_vm3, %v2487_v27  ;;  %v5488_v27 = vld [vmem:[%s5916_s22 + $0x28] sm:$0xff]   ;;  %v5490_v29 = vld [vmem:[%s5921_s3] sm:$0xff]   ;;  %s6666_s22 = sld [smem:[#allocation26_spill]] }
 0x45b   : > { %5201 = vmatprep.mubr.msk.bf16.mxu1 %vm5639_vm1, %v5638_v2  ;;  %5198 = vmatpush3.bf16.msra.mxu1 %v5475_v1  ;;  %v5491_v30 = vld [vmem:[%s5921_s3 + $0x10] sm:$0xff]  }
 0x45c   : > { %5199 = vmatprep.subr.bf16.mxu1 %v5638_v2  ;;  %5192 = vmatpush3.bf16.msra.mxu0 %v5476_v3 }
 0x45d   : > { %5205 = vmatprep.subr.bf16.mxu0 %v5638_v2 }
 0x45f   : > { %5200 = vmatpush3.bf16.msra.mxu1 %v5477_v4 }
 0x460   : > { %5213 = vmatprep.subr.bf16.mxu1 %v5638_v2 }
 0x521   : > { %v2532_v31 = vpop.f32.mrb[40].mxu0 }
 0x522   : > { %v5169_v32 = vpop.f32.mrb[41].mxu0  ;;  %v2676_v36 = vsel %vm1342_vm2, %v2532_v31, 0.0  ;;  %v5492_v31 = vld [vmem:[%s5921_s3 + $0x8] sm:$0xff]  }
 0x523   : > { %v2535_v33 = vpop.f32.mrb[42].mxu0  ;;  %v5493_v32 = vld [vmem:[%s5921_s3 + $0x18] sm:$0xff]  }
 0x524   : > { %v5170_v34 = vpop.f32.mrb[43].mxu0  ;;  %v5494_v33 = vld [vmem:[%s5921_s3 + $0x20] sm:$0xff]  }
 0x525   : > { %v2578_v35 = vpop.f32.mrb[40].mxu1  ;;  %v5495_v34 = vld [vmem:[%s5921_s3 + $0x30] sm:$0xff]  }
 0x526   : > { %v2677_v37 = vsel %vm1342_vm2, %v2578_v35, 0.0  ;;  %v5175_v38 = vpop.f32.mrb[41].mxu1  ;;  %v5496_v35 = vld [vmem:[%s5921_s3 + $0x28] sm:$0xff]  }
 0x527   : > { %v2678_v39 = vadd.f32 %v2677_v37, %v2676_v36  ;;  %v2581_v40 = vpop.f32.mrb[42].mxu1  ;;  %v5497_v36 = vld [vmem:[%s5921_s3 + $0x38] sm:$0xff]   ;;  %s6667_s3 = sld [smem:[#allocation27_spill]] }
 0x528   : > { %v5176_v41 = vpop.f32.mrb[43].mxu1 }
 0x529   : > { %v2624_v44 = vpop.f32.mrb[44].mxu0 }
 0x52a   : > { %v2679_v45 = vsel %vm1342_vm2, %v2624_v44, 0.0  ;;  %v5181_v46 = vpop.f32.mrb[45].mxu0 }
 0x52b   : > { %v2680_v47 = vadd.f32 %v2679_v45, %v2678_v39  ;;  %v2627_v48 = vpop.f32.mrb[46].mxu0 }
 0x52c   : > { %v5182_v49 = vpop.f32.mrb[47].mxu0 }
 0x52d   : > { %v2670_v50 = vpop.f32.mrb[44].mxu1 }
 0x52e   : > { %v2681_v51 = vsel %vm1342_vm2, %v2670_v50, 0.0  ;;  %v5187_v53 = vpop.f32.mrb[45].mxu1 }
 0x52f   : > { %v2682_v55 = vadd.f32 %v2681_v51, %v2680_v47  ;;  %v2673_v56 = vpop.f32.mrb[46].mxu1 }
 0x530   : > { %v5188_v57 = vpop.f32.mrb[47].mxu1  ;;  %v4820_v56 = vld [vmem:[%s5931_s29] ss:$0 sm:$0xff] }
 0x531   : > { %v2690_v58 = vadd.f32 %v4801_v52, %v2682_v55  ;;  %v4821_v57 = vld [vmem:[%s5931_s29 + $0x1] ss:$0 sm:$0xff] }
 0x533   : > { %v2691_v42 = vadd.f32 %v2690_v58, %v6009_v6 }
 0x535   : > { %v2694_v59 = vsel %vm1342_vm2, %v2691_v42, 0.0 }
 0x536   : > { %2695 = vadd.xlane.f32.xlu0 %v2694_v59 }
 0x5c3   : > { %v2696_v43 = vpop.xlane.xlu0 %2695 }
 0x5c4   : > { %v2698_v60 = vmul.f32 0.03125, %v2696_v43 }
 0x5c6   : > { %v2699_v61 = vsub.f32 %v2691_v42, %v2698_v60 }
 0x5c8   : > { %v2700_v62 = vmul.f32 %v2699_v61, %v2699_v61 }
 0x5ca   : > { %v2701_v63 = vsel %vm1342_vm2, %v2700_v62, 0.0 }
 0x5cb   : > { %2702 = vadd.xlane.f32.xlu1 %v2701_v63 }
 0x658   : > { %v2703_v6 = vpop.xlane.xlu1 %2702 }
 0x659   : > { %v2704_v5 = vmul.f32 0.03125, %v2703_v6  ;;  %v4804_v6 = vld [vmem:[%s6666_s22] ss:$0 sm:$0xff] }
 0x65b   : > { %v2705_v7 = vadd.f32 1e-05, %v2704_v5  ;;  %v4805_v5 = vld [vmem:[%s6666_s22 + $0x1] ss:$0 sm:$0xff] }
 0x65d   : > { %5520 = vrsqrt.f32 %v2705_v7 }
 0x667   : > { %v5521_v8 = vpop.eup %5520 }
 0x668   : > { %v2707_v10 = vmul.f32 %v5521_v8, %v2699_v61 }
 0x66a   : > { %v2714_v12 = vmul.f32 %v4802_v9, %v2707_v10  ;;  %v4822_v9 = vld [vmem:[%s5931_s29 + $0x2] ss:$0 sm:$0xff]  ;;  %v4823_v10 = vld [vmem:[%s5931_s29 + $0x3] ss:$0 sm:$0xff] }
 0x66c   : > { %v6232_v13 = vadd.f32 %v4803_v11, %v2714_v12 }
 0x66e   : > { %v2722_v16 = vpack.c.bf16 %v6232_v13, %v6232_v13 }
 0x670   : > { %5194 = vmatmul.mubr.msk.bf16.vlgmr.msra.gmra.mrb[48].mxu0 %vm1342_vm2, %v2722_v16  ;;  %5202 = vmatmul.mubr.msk.bf16.vlgmr.msra.gmra.mrb[48].mxu1 %vm1342_vm2, %v2722_v16 }
 0x671   : > { %5206 = vmatpush3.bf16.msra.mxu0 %v5478_v14  ;;  %5214 = vmatpush3.bf16.msra.mxu1 %v5479_v15 }
 0x672   : > { %5207 = vmatprep.subr.bf16.mxu0 %v5638_v2  ;;  %5215 = vmatprep.subr.bf16.mxu1 %v5638_v2 }
 0x673   : > { %5209 = vmatprep.mubr.msk.bf16.mxu0 %vm5639_vm1, %v5638_v2  ;;  %5217 = vmatprep.mubr.msk.bf16.mxu1 %vm5639_vm1, %v5638_v2 }
 0x675   : > { %5208 = vmatpush3.bf16.msra.mxu0 %v5480_v17  ;;  %5216 = vmatpush3.bf16.msra.mxu1 %v5481_v18 }
 0x676   : > { %5221 = vmatprep.subr.bf16.mxu0 %v5638_v2  ;;  %5229 = vmatprep.subr.bf16.mxu1 %v5638_v2 }
 0x678   : > { %5210 = vmatmul.mubr.msk.bf16.vlgmr.msra.gmra.mrb[52].mxu0 %vm1342_vm2, %v2722_v16  ;;  %5218 = vmatmul.mubr.msk.bf16.vlgmr.msra.gmra.mrb[52].mxu1 %vm1342_vm2, %v2722_v16 }
 0x679   : > { %5222 = vmatpush3.bf16.msra.mxu0 %v5482_v19  ;;  %5230 = vmatpush3.bf16.msra.mxu1 %v5483_v20 }
 0x67a   : > { %5223 = vmatprep.subr.bf16.mxu0 %v5638_v2  ;;  %5231 = vmatprep.subr.bf16.mxu1 %v5638_v2 }
 0x67b   : > { %5225 = vmatprep.mubr.msk.bf16.mxu0 %vm5639_vm1, %v5638_v2  ;;  %5233 = vmatprep.mubr.msk.bf16.mxu1 %vm5639_vm1, %v5638_v2 }
 0x67d   : > { %5224 = vmatpush3.bf16.msra.mxu0 %v5484_v21  ;;  %5232 = vmatpush3.bf16.msra.mxu1 %v5485_v22 }
 0x67e   : > { %5237 = vmatprep.subr.bf16.mxu0 %v5638_v2  ;;  %5245 = vmatprep.subr.bf16.mxu1 %v5638_v2 }
 0x680   : > { %5226 = vmatmul.mubr.msk.bf16.vlgmr.msra.gmra.mrb[56].mxu0 %vm1342_vm2, %v1278_v24  ;;  %5234 = vmatmul.mubr.msk.bf16.vlgmr.msra.gmra.mrb[56].mxu1 %vm1342_vm2, %v1278_v24 }
 0x681   : > { %5238 = vmatpush3.bf16.msra.mxu0 %v5486_v25  ;;  %5246 = vmatpush3.bf16.msra.mxu1 %v5487_v26 }
 0x682   : > { %5239 = vmatprep.subr.bf16.mxu0 %v5638_v2  ;;  %5247 = vmatprep.subr.bf16.mxu1 %v5638_v2 }
 0x683   : > { %5241 = vmatprep.mubr.msk.bf16.mxu0 %vm5639_vm1, %v5638_v2  ;;  %5249 = vmatprep.mubr.msk.bf16.mxu1 %vm5639_vm1, %v5638_v2 }
 0x685   : > { %5240 = vmatpush3.bf16.msra.mxu0 %v5488_v27  ;;  %5248 = vmatpush3.bf16.msra.mxu1 %v5489_v28  ;;  %v4806_v28 = vld [vmem:[%s6666_s22 + $0x2] ss:$0 sm:$0xff] }
 0x686   : > { %5253 = vmatprep.subr.bf16.mxu0 %v5638_v2  ;;  %5261 = vmatprep.subr.bf16.mxu1 %v5638_v2 }
 0x688   : > { %5242 = vmatmul.mubr.msk.bf16.vlgmr.msra.gmra.mrb[60].mxu0 %vm1342_vm2, %v1278_v24  ;;  %5250 = vmatmul.mubr.msk.bf16.vlgmr.msra.gmra.mrb[60].mxu1 %vm1342_vm2, %v1278_v24 }
 0x689   : > { %5254 = vmatpush3.bf16.msra.mxu0 %v5490_v29  ;;  %5257 = vmatprep.mubr.msk.bf16.mxu0 %vm5639_vm1, %v5638_v2  ;;  %v4807_v29 = vld [vmem:[%s6666_s22 + $0x3] ss:$0 sm:$0xff]  ;;  %s6680_s22 = scalar_lea.vmem %s6679_s26, %s5859_s7 }
 0x68a   : > { %5255 = vmatprep.subr.bf16.mxu0 %v5638_v2  ;;  %5265 = vmatprep.mubr.msk.bf16.mxu1 %vm5639_vm1, %v5638_v2 }
 0x68b   : > { %5262 = vmatpush3.bf16.msra.mxu1 %v5491_v30 }
 0x68c   : > { %5263 = vmatprep.subr.bf16.mxu1 %v5638_v2 }
 0x68d   : > { %5256 = vmatpush3.bf16.msra.mxu0 %v5492_v31 }
 0x68e   : > { %5269 = vmatprep.subr.bf16.mxu0 %v5638_v2 }
 0x68f   : > { %5264 = vmatpush3.bf16.msra.mxu1 %v5493_v32 }
 0x690   : > { %5258 = vmatmul.mubr.msk.bf16.vlgmr.msra.gmra.mrb[64].mxu0 %vm1342_vm2, %v1278_v24  ;;  %5277 = vmatprep.subr.bf16.mxu1 %v5638_v2 }
 0x691   : > { %5273 = vmatprep.mubr.msk.bf16.mxu0 %vm5639_vm1, %v5638_v2  ;;  %5270 = vmatpush3.bf16.msra.mxu0 %v5494_v33 }
 0x692   : > { %5266 = vmatmul.mubr.msk.bf16.vlgmr.msra.gmra.mrb[64].mxu1 %vm1342_vm2, %v1278_v24  ;;  %5271 = vmatprep.subr.bf16.mxu0 %v5638_v2 }
 0x693   : > { %5278 = vmatpush3.bf16.msra.mxu1 %v5495_v34  ;;  %5281 = vmatprep.mubr.msk.bf16.mxu1 %vm5639_vm1, %v5638_v2 }
 0x694   : > { %5279 = vmatprep.subr.bf16.mxu1 %v5638_v2 }
 0x695   : > { %5272 = vmatpush3.bf16.msra.mxu0 %v5496_v35 }
 0x696   : > { %5285 = vmatprep.subr.bf16.mxu0 %v5638_v2 }
 0x697   : > { %5280 = vmatpush3.bf16.msra.mxu1 %v5497_v36  ;;  %v4836_v36 = vld [vmem:[%s5936_s24] ss:$0 sm:$0xff] }
 0x698   : > { %5291 = vmatprep.subr.bf16.mxu1 %v5638_v2  ;;  %5274 = vmatmul.mubr.msk.bf16.vlgmr.msra.gmra.mrb[68].mxu0 %vm1342_vm2, %v1278_v24 }
 0x699   : > { %5287 = vmatprep.mubr.msk.bf16.mxu0 %vm5639_vm1, %v5638_v2 }
 0x69a   : > { %5282 = vmatmul.mubr.msk.bf16.vlgmr.msra.gmra.mrb[68].mxu1 %vm1342_vm2, %v1278_v24 }
 0x69b   : > { %5293 = vmatprep.mubr.msk.bf16.mxu1 %vm5639_vm1, %v5638_v2 }
 0x743   : > { %v2816_v37 = vpop.f32.mrb[48].mxu0  ;;  %v2868_v38 = vpop.f32.mrb[48].mxu1 }
 0x744   : > { %v5195_v39 = vpop.f32.mrb[49].mxu0  ;;  %v5203_v40 = vpop.f32.mrb[49].mxu1  ;;  %v2817_v11 = vadd.f32 %v4804_v6, %v2816_v37  ;;  %v2869_v12 = vadd.f32 %v4805_v5, %v2868_v38  ;;  %v4837_v38 = vld [vmem:[%s5936_s24 + $0x1] ss:$0 sm:$0xff] }
 0x745   : > { %v2819_v41 = vpop.f32.mrb[50].mxu0  ;;  %v2871_v44 = vpop.f32.mrb[50].mxu1 }
 0x746   : > { %v5196_v45 = vpop.f32.mrb[51].mxu0  ;;  %v5204_v46 = vpop.f32.mrb[51].mxu1  ;;  %v3485_v22 = vpack.c.bf16 %v2817_v11, %v2817_v11  ;;  %v3486_v23 = vpack.c.bf16 %v2869_v12, %v2869_v12 }
 0x74b   : > { %v2920_v47 = vpop.f32.mrb[52].mxu0  ;;  %v2972_v48 = vpop.f32.mrb[52].mxu1 }
 0x74c   : > { %v5211_v49 = vpop.f32.mrb[53].mxu0  ;;  %v5219_v50 = vpop.f32.mrb[53].mxu1  ;;  %v2921_v32 = vadd.f32 %v4806_v28, %v2920_v47  ;;  %v2973_v33 = vadd.f32 %v4807_v29, %v2972_v48 }
 0x74d   : > { %v2923_v51 = vpop.f32.mrb[54].mxu0  ;;  %v2975_v52 = vpop.f32.mrb[54].mxu1 }
 0x74e   : > { %v5212_v53 = vpop.f32.mrb[55].mxu0  ;;  %v5220_v55 = vpop.f32.mrb[55].mxu1  ;;  %v3487_v34 = vpack.c.bf16 %v2921_v32, %v2921_v32  ;;  %v3488_v35 = vpack.c.bf16 %v2973_v33, %v2973_v33 }
 0x753   : > { %v3071_v58 = vpop.f32.mrb[56].mxu0  ;;  %v3123_v42 = vpop.f32.mrb[56].mxu1 }
 0x754   : > { %v3072_v59 = vadd.f32 %v4820_v56, %v3071_v58  ;;  %v3124_v43 = vadd.f32 %v4821_v57, %v3123_v42  ;;  %v5227_v60 = vpop.f32.mrb[57].mxu0  ;;  %v5235_v61 = vpop.f32.mrb[57].mxu1 }
 0x755   : > { %v3074_v62 = vpop.f32.mrb[58].mxu0  ;;  %v3126_v63 = vpop.f32.mrb[58].mxu1 }
 0x756   : > { %v3489_v0 = vpack.c.bf16 %v3072_v59, %v3072_v59  ;;  %v3490_v1 = vpack.c.bf16 %v3124_v43, %v3124_v43  ;;  %v5228_v3 = vpop.f32.mrb[59].mxu0  ;;  %v5236_v4 = vpop.f32.mrb[59].mxu1 }
 0x758   : > { %v3497_v7 = vsel %vm2054_vm3, %v3489_v0, 0  ;;  %v3543_v8 = vsel %vm2054_vm3, %v3490_v1, 0 }
 0x759   : > { %5286 = vmatpush3.bf16.xpose.msra.mxu0 %v3497_v7  ;;  %5292 = vmatpush3.bf16.xpose.msra.mxu1 %v3543_v8 }
 0x75a   : > { %5297 = vmatprep.subr.bf16.mxu0 %v5638_v2  ;;  %5303 = vmatprep.subr.bf16.mxu1 %v5638_v2 }
 0x75b   : > { %v3175_v14 = vpop.f32.mrb[60].mxu0  ;;  %v3227_v15 = vpop.f32.mrb[60].mxu1 }
 0x75c   : > { %v3176_v16 = vadd.f32 %v4822_v9, %v3175_v14  ;;  %v3228_v17 = vadd.f32 %v4823_v10, %v3227_v15  ;;  %v5243_v18 = vpop.f32.mrb[61].mxu0  ;;  %v5251_v19 = vpop.f32.mrb[61].mxu1 }
 0x75d   : > { %v3178_v20 = vpop.f32.mrb[62].mxu0  ;;  %v3230_v21 = vpop.f32.mrb[62].mxu1 }
 0x75e   : > { %v3491_v24 = vpack.c.bf16 %v3176_v16, %v3176_v16  ;;  %v3492_v25 = vpack.c.bf16 %v3228_v17, %v3228_v17  ;;  %v5244_v26 = vpop.f32.mrb[63].mxu0  ;;  %v5252_v27 = vpop.f32.mrb[63].mxu1 }
 0x760   : > { %v3589_v30 = vsel %vm2054_vm3, %v3491_v24, 0  ;;  %v3635_v31 = vsel %vm2054_vm3, %v3492_v25, 0  ;;  %5288 = vmatmul.mubr.msk.bf16.vlgmr.msra.gmra.mrb[72].mxu0 %vm2054_vm3, %v3485_v22  ;;  %5294 = vmatmul.mubr.msk.bf16.vlgmr.msra.gmra.mrb[72].mxu1 %vm2054_vm3, %v3486_v23 }
 0x761   : > { %5298 = vmatpush3.bf16.xpose.msra.mxu0 %v3589_v30  ;;  %5304 = vmatpush3.bf16.xpose.msra.mxu1 %v3635_v31 }
 0x762   : > { %5299 = vmatprep.mubr.msk.bf16.mxu0 %vm5639_vm1, %v5638_v2  ;;  %5305 = vmatprep.mubr.msk.bf16.mxu1 %vm5639_vm1, %v5638_v2 }
 0x763   : > { %5309 = vmatprep.subr.bf16.mxu0 %v5638_v2  ;;  %5315 = vmatprep.subr.bf16.mxu1 %v5638_v2  ;;  %v3323_v37 = vpop.f32.mrb[64].mxu0 }
 0x764   : > { %v3324_v39 = vadd.f32 %v4836_v36, %v3323_v37  ;;  %v5259_v40 = vpop.f32.mrb[65].mxu0 }
 0x765   : > { %v3326_v41 = vpop.f32.mrb[66].mxu0  ;;  %v3375_v44 = vpop.f32.mrb[64].mxu1 }
 0x766   : > { %v3733_v45 = vpack.c.bf16 %v3324_v39, %v3324_v39  ;;  %v3376_v46 = vadd.f32 %v4837_v38, %v3375_v44  ;;  %v5260_v47 = vpop.f32.mrb[67].mxu0  ;;  %v5267_v48 = vpop.f32.mrb[65].mxu1 }
 0x767   : > { %v3378_v49 = vpop.f32.mrb[66].mxu1 }
 0x768   : > { %5300 = vmatmul.mubr.msk.bf16.vlgmr.msra.gmra.mrb[76].mxu0 %vm2054_vm3, %v3487_v34  ;;  %5306 = vmatmul.mubr.msk.bf16.vlgmr.msra.gmra.mrb[76].mxu1 %vm2054_vm3, %v3488_v35  ;;  %v3741_v50 = vsel %vm2302_vm4, %v3733_v45, 0  ;;  %v3734_v51 = vpack.c.bf16 %v3376_v46, %v3376_v46  ;;  %v5268_v52 = vpop.f32.mrb[67].mxu1 }
 0x769   : > { %5311 = vmatprep.mubr.msk.bf16.mxu0 %vm5639_vm1, %v5638_v2  ;;  %5317 = vmatprep.mubr.msk.bf16.mxu1 %vm5639_vm1, %v5638_v2 }
 0x76a   : > { %5310 = vmatpush3.bf16.msra.mxu0 %v3741_v50  ;;  %v3787_v53 = vsel %vm2302_vm4, %v3734_v51, 0  ;;  %v4839_v50 = vld [vmem:[%s5936_s24 + $0x3] ss:$0 sm:$0xff]  ;;  %v4838_v51 = vld [vmem:[%s5936_s24 + $0x2] ss:$0 sm:$0xff]  ;;  %s6668_s24 = sld [smem:[#allocation44_spill]] }
 0x76b   : > { %5321 = vmatprep.subr.bf16.mxu0 %v5638_v2  ;;  %5316 = vmatpush3.bf16.msra.mxu1 %v3787_v53  ;;  %v6347_v55 = vpop.f32.mrb[68].mxu0 }
 0x76c   : > { %5327 = vmatprep.subr.bf16.mxu1 %v5638_v2  ;;  %v5275_v57 = vpop.f32.mrb[69].mxu0 }
 0x76d   : > { %v6349_v56 = vpop.f32.mrb[68].mxu1  ;;  %v3430_v42 = vpop.f32.mrb[70].mxu0  ;;  %v3428_v57 = vadd.f32 %v4838_v51, %v6347_v55 }
 0x76e   : > { %v5283_v58 = vpop.f32.mrb[69].mxu1  ;;  %v5276_v43 = vpop.f32.mrb[71].mxu0  ;;  %v3480_v52 = vadd.f32 %v4839_v50, %v6349_v56 }
 0x76f   : > { %v3482_v59 = vpop.f32.mrb[70].mxu1 }
 0x770   : > { %v5284_v60 = vpop.f32.mrb[71].mxu1  ;;  %v3736_v43 = vpack.c.bf16 %v3480_v52, %v3480_v52  ;;  %s6669_s19 = scalar_lea.vmem %s6668_s24, %s5859_s7 }
 0x833   : > { %v3533_v61 = vpop.f32.mrb[72].mxu0  ;;  %v3579_v62 = vpop.f32.mrb[72].mxu1 }
 0x834   : > { %v3677_v63 = vmul.f32 0.35355338, %v3533_v61  ;;  %v3678_v0 = vmul.f32 0.35355338, %v3579_v62  ;;  %v5289_v1 = vpop.f32.mrb[73].mxu0  ;;  %v5295_v3 = vpop.f32.mrb[73].mxu1  ;;  %v3735_v61 = vpack.c.bf16 %v3428_v57, %v3428_v57 }
 0x835   : > { %v3536_v4 = vpop.f32.mrb[74].mxu0  ;;  %v3582_v6 = vpop.f32.mrb[74].mxu1  ;;  %v3879_v1 = vsel %vm2302_vm4, %v3736_v43, 0  ;;  %v3926_v3 = vld [vmem:[%s6667_s3 + $0x4] sm:$0xf] }
 0x836   : > { %v5290_v5 = vpop.f32.mrb[75].mxu0  ;;  %v5296_v7 = vpop.f32.mrb[75].mxu1  ;;  %v3682_v8 = vadd.f32 %v3678_v0, %v6144_v54  ;;  %v3681_v9 = vadd.f32 %v3677_v63, %v6144_v54  ;;  %v3833_v56 = vsel %vm2302_vm4, %v3735_v61, 0 }
 0x837   : > { %v3925_v5 = vld [vmem:[%s6667_s3] sm:$0xf] }
 0x838   : > { %v3688_v10 = vsel %vm2054_vm3, %v3682_v8, -inf  ;;  %v3685_v11 = vsel %vm2054_vm3, %v3681_v9, -inf }
 0x839   : > { %3689 = vmax.xlane.f32.xlu1 %v3688_v10  ;;  %3686 = vmax.xlane.f32.xlu0 %v3685_v11  ;;  %v3933_v11 = vsel %vm2302_vm4, %v3925_v5, 0  ;;  %v5498_v5 = vld [vmem:[%s5974_s1] sm:$0xff]  }
 0x83b   : > { %v3625_v12 = vpop.f32.mrb[76].mxu0  ;;  %v3671_v14 = vpop.f32.mrb[76].mxu1 }
 0x83c   : > { %v3679_v15 = vmul.f32 0.35355338, %v3625_v12  ;;  %v3680_v16 = vmul.f32 0.35355338, %v3671_v14  ;;  %v5301_v17 = vpop.f32.mrb[77].mxu0  ;;  %v5307_v18 = vpop.f32.mrb[77].mxu1 }
 0x83d   : > { %v3628_v19 = vpop.f32.mrb[78].mxu0  ;;  %v3674_v20 = vpop.f32.mrb[78].mxu1  ;;  %v3928_v12 = vld [vmem:[%s6667_s3 + $0xc] sm:$0xf]  ;;  %v3927_v14 = vld [vmem:[%s6667_s3 + $0x8] sm:$0xf] }
 0x83e   : > { %v5302_v21 = vpop.f32.mrb[79].mxu0  ;;  %v5308_v22 = vpop.f32.mrb[79].mxu1  ;;  %v3684_v23 = vadd.f32 %v3680_v16, %v6144_v54  ;;  %v3683_v24 = vadd.f32 %v3679_v15, %v6144_v54  ;;  %v4071_v19 = vsel %vm2302_vm4, %v3928_v12, 0 }
 0x840   : > { %v3694_v25 = vsel %vm2054_vm3, %v3684_v23, -inf  ;;  %v3691_v26 = vsel %vm2054_vm3, %v3683_v24, -inf }
 0x841   : > { %3695 = vmax.xlane.f32.xlu1 %v3694_v25  ;;  %3692 = vmax.xlane.f32.xlu0 %v3691_v26 }
 0x8c6   : > { %v3690_v27 = vpop.xlane.xlu1 %3689  ;;  %v3687_v28 = vpop.xlane.xlu0 %3686 }
 0x8c7   : > { %v3698_v29 = vsub.f32 %v3682_v8, %v3690_v27  ;;  %v3697_v30 = vsub.f32 %v3681_v9, %v3687_v28  ;;  %v3979_v9 = vsel %vm2302_vm4, %v3926_v3, 0 }
 0x8c9   : > { %v3703_v31 = vmul.f32 1.442695, %v3698_v29  ;;  %v3701_v32 = vmul.f32 1.442695, %v3697_v30 }
 0x8cb   : > { %5522 = vpow2.f32 %v3703_v31 }
 0x8cc   : > { %5524 = vpow2.f32 %v3701_v32 }
 0x8ce   : > { %v3696_v33 = vpop.xlane.xlu1 %3695  ;;  %v3693_v34 = vpop.xlane.xlu0 %3692 }
 0x8cf   : > { %v3700_v35 = vsub.f32 %v3684_v23, %v3696_v33  ;;  %v3699_v36 = vsub.f32 %v3683_v24, %v3693_v34  ;;  %v4025_v23 = vsel %vm2302_vm4, %v3927_v14, 0  ;;  %v4865_v14 = vld [vmem:[%s6671_s4] ss:$0 sm:$0xff] }
 0x8d1   : > { %v3707_v37 = vmul.f32 1.442695, %v3700_v35  ;;  %v3705_v54 = vmul.f32 1.442695, %v3699_v36 }
 0x8d3   : > { %5526 = vpow2.f32 %v3707_v37 }
 0x8d4   : > { %5528 = vpow2.f32 %v3705_v54 }
 0x8d5   : > { %v5523_v38 = vpop.eup %5522 }
 0x8d6   : > { %v5525_v39 = vpop.eup %5524  ;;  %v3712_v40 = vsel %vm2054_vm3, %v5523_v38, 0.0 }
 0x8d7   : > { %3713 = vadd.xlane.f32.xlu1 %v3712_v40  ;;  %v3709_v41 = vsel %vm2054_vm3, %v5525_v39, 0.0 }
 0x8d8   : > { %3710 = vadd.xlane.f32.xlu0 %v3709_v41 }
 0x8dd   : > { %v5527_v44 = vpop.eup %5526 }
 0x8de   : > { %v5529_v45 = vpop.eup %5528  ;;  %v3718_v46 = vsel %vm2054_vm3, %v5527_v44, 0.0 }
 0x8df   : > { %3719 = vadd.xlane.f32.xlu1 %v3718_v46  ;;  %v3715_v47 = vsel %vm2054_vm3, %v5529_v45, 0.0 }
 0x8e0   : > { %3716 = vadd.xlane.f32.xlu0 %v3715_v47 }
 0x964   : > { %v3714_v48 = vpop.xlane.xlu1 %3713 }
 0x965   : > { %5530 = vrcp.f32 %v3714_v48  ;;  %v3711_v49 = vpop.xlane.xlu0 %3710 }
 0x966   : > { %5532 = vrcp.f32 %v3711_v49 }
 0x96c   : > { %v3720_v53 = vpop.xlane.xlu1 %3719 }
 0x96d   : > { %5534 = vrcp.f32 %v3720_v53  ;;  %v3717_v58 = vpop.xlane.xlu0 %3716 }
 0x96e   : > { %5536 = vrcp.f32 %v3717_v58 }
 0x96f   : > { %v5531_v42 = vpop.eup %5530 }
 0x970   : > { %v5533_v59 = vpop.eup %5532  ;;  %v3726_v60 = vmul.f32 %v5531_v42, %v5523_v38 }
 0x971   : > { %v3725_v62 = vmul.f32 %v5533_v59, %v5525_v39 }
 0x972   : > { %v3730_v63 = vpack.c.bf16 %v3726_v60, %v3726_v60  ;;  %v4864_v60 = vld [vmem:[%s6669_s19] ss:$0 sm:$0xff]  ;;  %s4355_s19 = sshll.u32 %s5991_s10, 4  ;;  %s6469_s19 = int_to_ptr.vmem [resolvable:$true] %s4355_s19 }
 0x973   : > { %v3729_v0 = vpack.c.bf16 %v3725_v62, %v3725_v62  ;;  %s5542_s7 = scalar_lea.vmem %s6469_s19, 128 }
 0x974   : > { %5318 = vmatmul.mubr.msk.bf16.vlgmr.msra.gmra.mrb[80].mxu1 %vm2054_vm3, %v3730_v63  ;;  %p5543_p1 = scmp.ne.s32.totalorder %s6469_s19, %s5542_s7 }
 0x975   : > { %5312 = vmatmul.mubr.msk.bf16.vlgmr.msra.gmra.mrb[80].mxu0 %vm2054_vm3, %v3729_v0  ;;  %5328 = vmatpush3.bf16.msra.mxu1 %v3879_v1 }
 0x976   : > { %5322 = vmatpush3.bf16.msra.mxu0 %v3833_v56  ;;  %5323 = vmatprep.mubr.msk.bf16.mxu0 %vm5639_vm1, %v5638_v2  ;;  %p5544_p2 = pnand %p5543_p1, %p5830_p3 }
 0x977   : > { %v5535_v55 = vpop.eup %5534  ;;  %5329 = vmatprep.mubr.msk.bf16.mxu1 %vm5639_vm1, %v5638_v2  ;;  %5333 = vmatprep.subr.bf16.mxu0 %v5638_v2 }
 0x978   : > { %v5537_v4 = vpop.eup %5536  ;;  %v3728_v6 = vmul.f32 %v5535_v55, %v5527_v44  ;;  %5339 = vmatprep.subr.bf16.mxu1 %v5638_v2  ;;  %p5545_p4 = pneg %p5544_p2 }
 0x979   : > { %v3727_v7 = vmul.f32 %v5537_v4, %v5529_v45 }
 0x97a   : > { %v3732_v8 = vpack.c.bf16 %v3728_v6, %v3728_v6 }
 0x97b   : > { %v3731_v10 = vpack.c.bf16 %v3727_v7, %v3727_v7  ;;  %v5499_v7 = vld [vmem:[%s5974_s1 + $0x8] sm:$0xff]  }
 0x97c   : > { %5330 = vmatmul.mubr.msk.bf16.vlgmr.msra.gmra.mrb[84].mxu1 %vm2054_vm3, %v3732_v8  ;;  %v5501_v8 = vld [vmem:[%s5988_s21 + $0x8] sm:$0xff]  }
 0x97d   : > { %5324 = vmatmul.mubr.msk.bf16.vlgmr.msra.gmra.mrb[84].mxu0 %vm2054_vm3, %v3731_v10  ;;  %5340 = vmatpush3.bf16.msra.mxu1 %v3979_v9 }
 0x97e   : > { %5334 = vmatpush3.bf16.msra.mxu0 %v3933_v11  ;;  %5335 = vmatprep.mubr.msk.bf16.mxu0 %vm5639_vm1, %v5638_v2 }
 0x97f   : > { %5341 = vmatprep.mubr.msk.bf16.mxu1 %vm5639_vm1, %v5638_v2  ;;  %5345 = vmatprep.subr.bf16.mxu0 %v5638_v2 }
 0x980   : > { %5351 = vmatprep.subr.bf16.mxu1 %v5638_v2 }
 0xa47   : > { %v3823_v15 = vpop.f32.mrb[80].mxu1 }
 0xa48   : > { %v3777_v16 = vpop.f32.mrb[80].mxu0  ;;  %v3922_v17 = vpack.c.bf16 %v3823_v15, %v3823_v15  ;;  %v5319_v18 = vpop.f32.mrb[81].mxu1 }
 0xa49   : > { %v3921_v20 = vpack.c.bf16 %v3777_v16, %v3777_v16  ;;  %v5313_v21 = vpop.f32.mrb[81].mxu0  ;;  %v3826_v22 = vpop.f32.mrb[82].mxu1  ;;  %v4866_v16 = vld [vmem:[%s6673_s13] ss:$0 sm:$0xff] }
 0xa4a   : > { %v3780_v24 = vpop.f32.mrb[82].mxu0  ;;  %v5320_v25 = vpop.f32.mrb[83].mxu1  ;;  %5342 = vmatmul.mubr.msk.bf16.vlgmr.msra.gmra.mrb[88].mxu1 %vm2054_vm3, %v3922_v17  ;;  %v5503_v21 = vld [vmem:[%s5988_s21 + $0x18] sm:$0xff]   ;;  %v4867_v22 = vld [vmem:[%s1259_s23] ss:$0 sm:$0xff] }
 0xa4b   : > { %v5314_v26 = vpop.f32.mrb[83].mxu0  ;;  %5336 = vmatmul.mubr.msk.bf16.vlgmr.msra.gmra.mrb[88].mxu0 %vm2054_vm3, %v3921_v20  ;;  %5352 = vmatpush3.bf16.msra.mxu1 %v4071_v19  ;;  %v5502_v20 = vld [vmem:[%s5988_s21 + $0x10] sm:$0xff]  }
 0xa4c   : > { %5346 = vmatpush3.bf16.msra.mxu0 %v4025_v23  ;;  %5347 = vmatprep.mubr.msk.bf16.mxu0 %vm5639_vm1, %v5638_v2 }
 0xa4d   : > { %5353 = vmatprep.mubr.msk.bf16.mxu1 %vm5639_vm1, %v5638_v2  ;;  %5357 = vmatprep.subr.bf16.mxu0 %v5638_v2 }
 0xa4e   : > { %5365 = vmatprep.subr.bf16.mxu1 %v5638_v2 }
 0xa4f   : > { %v3915_v27 = vpop.f32.mrb[84].mxu1 }
 0xa50   : > { %v3869_v28 = vpop.f32.mrb[84].mxu0  ;;  %v3924_v29 = vpack.c.bf16 %v3915_v27, %v3915_v27  ;;  %v5331_v30 = vpop.f32.mrb[85].mxu1 }
 0xa51   : > { %v3923_v31 = vpack.c.bf16 %v3869_v28, %v3869_v28  ;;  %v5325_v32 = vpop.f32.mrb[85].mxu0  ;;  %v3918_v33 = vpop.f32.mrb[86].mxu1 }
 0xa52   : > { %v3872_v34 = vpop.f32.mrb[86].mxu0  ;;  %v5332_v35 = vpop.f32.mrb[87].mxu1  ;;  %5354 = vmatmul.mubr.msk.bf16.vlgmr.msra.gmra.mrb[92].mxu1 %vm2054_vm3, %v3924_v29 }
 0xa53   : > { %v5326_v36 = vpop.f32.mrb[87].mxu0  ;;  %5348 = vmatmul.mubr.msk.bf16.vlgmr.msra.gmra.mrb[92].mxu0 %vm2054_vm3, %v3923_v31  ;;  %5373 = vmatprep.mubr.msk.bf16.mxu1 %vm5639_vm1, %v5638_v2 }
 0xa54   : > { %5361 = vmatprep.mubr.msk.bf16.mxu0 %vm5639_vm1, %v5638_v2  ;;  %5358 = vmatpush3.bf16.msra.mxu0 %v5498_v5 }
 0xa55   : > { %5359 = vmatprep.subr.bf16.mxu0 %v5638_v2 }
 0xa58   : > { %5360 = vmatpush3.bf16.msra.mxu0 %v5499_v7 }
 0xb1d   : > { %v4015_v37 = vpop.f32.mrb[88].mxu1 }
 0xb1e   : > { %v3969_v54 = vpop.f32.mrb[88].mxu0  ;;  %v4114_v38 = vsel %vm1342_vm2, %v4015_v37, 0.0  ;;  %v5343_v39 = vpop.f32.mrb[89].mxu1 }
 0xb1f   : > { %v4113_v40 = vsel %vm1342_vm2, %v3969_v54, 0.0  ;;  %v5337_v41 = vpop.f32.mrb[89].mxu0  ;;  %v4018_v44 = vpop.f32.mrb[90].mxu1 }
 0xb20   : > { %v4115_v45 = vadd.f32 %v4114_v38, %v4113_v40  ;;  %v3972_v46 = vpop.f32.mrb[90].mxu0  ;;  %v5344_v47 = vpop.f32.mrb[91].mxu1 }
 0xb21   : > { %v5338_v48 = vpop.f32.mrb[91].mxu0  ;;  %v4877_v47 = vld [vmem:[%s6680_s22] ss:$0 sm:$0xff] }
 0xb25   : > { %v4107_v49 = vpop.f32.mrb[92].mxu1 }
 0xb26   : > { %v4061_v50 = vpop.f32.mrb[92].mxu0  ;;  %v5355_v51 = vpop.f32.mrb[93].mxu1  ;;  %v4118_v43 = vsel %vm1342_vm2, %v4107_v49, 0.0  ;;  %v4878_v49 = vld [vmem:[%s1251_s11] ss:$0 sm:$0xff]  ;;  %s5640_s11 = smov [#allocation2]  }
 0xb27   : > { %v4116_v52 = vsel %vm1342_vm2, %v4061_v50, 0.0  ;;  %v5349_v53 = vpop.f32.mrb[93].mxu0  ;;  %v4110_v57 = vpop.f32.mrb[94].mxu1  ;;  %s5546_s13 = sshll.u32 %s5640_s11, 4  ;;  %s5547_s13 = int_to_ptr.vmem [resolvable:$false] %s5546_s13 }
 0xb28   : > { %v4117_v58 = vadd.f32 %v4116_v52, %v4115_v45  ;;  %v4064_v42 = vpop.f32.mrb[94].mxu0  ;;  %v5356_v59 = vpop.f32.mrb[95].mxu1  ;;  %s5548_s9 = scalar_lea.vmem %s5547_s13, 256  ;;  %p5549_p5 = scmp.lt.s32.totalorder %s6469_s19, %s5547_s13 }
 0xb29   : > { %v5350_v61 = vpop.f32.mrb[95].mxu0  ;;  %p5550_p6 = scmp.lt.s32.totalorder %s5548_s9, %s5542_s7 }
 0xb2a   : > { %v4119_v62 = vadd.f32 %v4118_v43, %v4117_v58 }
 0xb2b   : > { %p5551_p7 = por %p5550_p6, %p5549_p5 }
 0xb2c   : > { %v4127_v63 = vadd.f32 %v4864_v60, %v4119_v62 }
 0xb2d   : > { %p5552_p8 = pnand %p5551_p7, %p5545_p4 }
 0xb2e   : > { %v4128_v0 = vadd.f32 %v4127_v63, %v6232_v13  ;;  %v5500_v13 = vld [vmem:[%s5988_s21] sm:$0xff]   ;;  %s6676_s21 = sld [smem:[#allocation9_spill]] }
 0xb2f   : > { %5366 = vmatpush3.bf16.msra.mxu1 %v5500_v13 }
 0xb30   : > { %v4131_v1 = vsel %vm1342_vm2, %v4128_v0, 0.0  ;;  %5367 = vmatprep.subr.bf16.mxu1 %v5638_v2 }
 0xb31   : > { %4132 = vadd.xlane.f32.xlu0 %v4131_v1 }
 0xb33   : > { %5368 = vmatpush3.bf16.msra.mxu1 %v5501_v8 }
 0xb34   : > { %5369 = vmatprep.subr.bf16.mxu1 %v5638_v2  ;;  %s4880_s24 = sshll.u32 %s6676_s21, 7 }
 0xb35   : > { %s6467_s4 = scalar_lea.hbm %s6682_s0, %s4880_s24 }
 0xb37   : > { %5370 = vmatpush3.bf16.msra.mxu1 %v5502_v20 }
 0xb38   : > { %5371 = vmatprep.subr.bf16.mxu1 %v5638_v2  ;;  %v4871_v2 = vld [vmem:[%s1267_s20] ss:$0 sm:$0xff]  ;;  %s6677_s20 = sld [smem:[#allocation6_spill]] }
 0xb3b   : > { %5372 = vmatpush3.bf16.msra.mxu1 %v5503_v21 }
 0xb3e   : > { %s6684_s6 = sand.u32 1, %s6677_s20  }
 0xb3f   : > { %s4342_s12 = scalar_lea.sflag [#allocation3], %s6684_s6 }
 0xbbe   : > { %v4133_v56 = vpop.xlane.xlu0 %4132 }
 0xbbf   : > { %v4134_v55 = vmul.f32 0.03125, %v4133_v56 }
 0xbc1   : > { %v4135_v3 = vsub.f32 %v4128_v0, %v4134_v55 }
 0xbc3   : > { %v4136_v4 = vmul.f32 %v4135_v3, %v4135_v3 }
 0xbc5   : > { %v4137_v6 = vsel %vm1342_vm2, %v4136_v4, 0.0 }
 0xbc6   : > { %4138 = vadd.xlane.f32.xlu1 %v4137_v6 }
 0xc53   : > { %v4139_v9 = vpop.xlane.xlu1 %4138 }
 0xc54   : > { %v4140_v10 = vmul.f32 0.03125, %v4139_v9 }
 0xc56   : > { %v4141_v11 = vadd.f32 1e-05, %v4140_v10 }
 0xc58   : > { %5538 = vrsqrt.f32 %v4141_v11 }
 0xc62   : > { %v5539_v12 = vpop.eup %5538 }
 0xc63   : > { %v4143_v15 = vmul.f32 %v5539_v12, %v4135_v3 }
 0xc65   : > { %v4150_v17 = vmul.f32 %v4865_v14, %v4143_v15 }
 0xc67   : > { %v4157_v18 = vadd.f32 %v4866_v16, %v4150_v17 }
 0xc69   : > { %v4158_v19 = vpack.c.bf16 %v4157_v18, %v4157_v18 }
 0xc6b   : > { %5362 = vmatmul.mubr.msk.bf16.vlgmr.msra.gmra.mrb[96].mxu0 %vm1342_vm2, %v4158_v19 }
 0xd3e   : > { %v4219_v23 = vpop.f32.mrb[96].mxu0 }
 0xd3f   : > { %v4220_v24 = vadd.f32 %v4867_v22, %v4219_v23  ;;  %v5363_v25 = vpop.f32.mrb[97].mxu0 }
 0xd40   : > { %v4222_v26 = vpop.f32.mrb[98].mxu0 }
 0xd41   : > { %v4225_v27 = vmax.f32 %v4220_v24, 0.0  ;;  %v5364_v28 = vpop.f32.mrb[99].mxu0 }
 0xd43   : > { %v4226_v29 = vpack.c.bf16 %v4225_v27, %v4225_v27 }
 0xd45   : > { %5374 = vmatmul.mubr.msk.bf16.vlgmr.msra.gmra.mrb[96].mxu1 %vm4266_vm6, %v4226_v29 }
 0xe18   : > { %v4304_v30 = vpop.f32.mrb[96].mxu1 }
 0xe19   : > { %v4305_v31 = vadd.f32 %v4871_v2, %v4304_v30  ;;  %v5375_v32 = vpop.f32.mrb[97].mxu1 }
 0xe1a   : > { %v4307_v33 = vpop.f32.mrb[98].mxu1 }
 0xe1b   : > { %v5376_v34 = vpop.f32.mrb[99].mxu1  ;;  %v4310_v35 = vadd.f32 %v4305_v31, %v4157_v18 }
 0xe1d   : > { %v4313_v36 = vsel %vm1342_vm2, %v4310_v35, 0.0 }
 0xe1e   : > { %4314 = vadd.xlane.f32.xlu0 %v4313_v36 }
 0xeab   : > { %v4315_v37 = vpop.xlane.xlu0 %4314 }
 0xeac   : > { %v4316_v54 = vmul.f32 0.03125, %v4315_v37 }
 0xeae   : > { %v4317_v38 = vsub.f32 %v4310_v35, %v4316_v54 }
 0xeb0   : > { %v4318_v39 = vmul.f32 %v4317_v38, %v4317_v38 }
 0xeb2   : > { %v4319_v40 = vsel %vm1342_vm2, %v4318_v39, 0.0 }
 0xeb3   : > { %4320 = vadd.xlane.f32.xlu1 %v4319_v40 }
 0xf40   : > { %v4321_v41 = vpop.xlane.xlu1 %4320 }
 0xf41   : > { %v4322_v44 = vmul.f32 0.03125, %v4321_v41 }
 0xf43   : > { %v4323_v45 = vadd.f32 1e-05, %v4322_v44 }
 0xf45   : > { %5540 = vrsqrt.f32 %v4323_v45 }
 0xf4f   : > { %v5541_v46 = vpop.eup %5540 }
 0xf50   : > { %v4325_v48 = vmul.f32 %v5541_v46, %v4317_v38 }
 0xf52   : > { %v4332_v50 = vmul.f32 %v4877_v47, %v4325_v48 }
 0xf54   : > { %v4339_v51 = vadd.f32 %v4878_v49, %v4332_v50 }
 0xf56   : > { %4340 = vst.msk [vmem:[%s5991_s10] sm:$0xff] %vm1342_vm2, %v4339_v51 }
 0xf57   : > { %5555 = shalt.err (!%p5552_p8)
}
 0xf58   : > { %s5556_s10 = scalar_lea.hbm %s6467_s4, 128  ;;  %s5560_s25 = scalar_lea.hbm %s6683_s2, 256 }
 0xf59   : > { %p5557_p10 = scmp.ne.s32.totalorder %s6467_s4, %s5556_s10  ;;  %p5561_p13 = scmp.lt.u32.totalorder %s6467_s4, %s6683_s2 }
 0xf5a   : > { %p5562_p0 = scmp.lt.u32.totalorder %s5560_s25, %s5556_s10  ;;  %p5564_p2 = scmp.lt.u32.totalorder %s5556_s10, %s6467_s4 }
 0xf5b   : > { %p5558_p11 = pnand %p5557_p10, %p5830_p3 }
 0xf5c   : > { %p5563_p1 = por %p5562_p0, %p5561_p13 }
 0xf5d   : > { %p5559_p12 = pneg %p5558_p11 }
 0xf5e   : > { %p5565_p4 = por %p5564_p2, %p5563_p1 }
 0xf60   : > { %p5566_p5 = pnand %p5565_p4, %p5559_p12 }
 0xf62   : > { %5569 = shalt.err (!%p5566_p5)
}
 0xf63   : > { %5377 = dma.vmem_to_hbm [thread:$0]  (%p5830_p3), %s6469_s19, 128, %s6467_s4, %s4342_s12  }
 0xf64 PF: > { %s6685_s21 = sld [smem:[#allocation12_spill]]  ;;  %s6686_s20 = sld [smem:[#allocation5_spill]] }
 0xf6a   : > { %p5383_p6 = scmp.ge.s32.totalorder %s6685_s21, 2  ;;  %s4367_s16 = sand.u32 1, %s6686_s20  }
 0xf6b   : > { %s4368_s26 = scalar_lea.sflag [#allocation3], %s4367_s16 }
 0xf6c   : > { %p5380_p7 = pnand %p5383_p6, %p5840_p9 }
 0xf6e   : > { %5603 = dma.done.wait (!%p5380_p7), %s4368_s26, 128  }
 0xf6f   : > { %5605 = vsyncadd (!%p5380_p7), %s4368_s26, 4294967168  ;;  %s40_s0 = sadd.s32 1, %s6685_s21   ;;  %s6688_s7 = sld [smem:[#allocation6_spill]] }
 0xf70   : > { %p37_p8 = scmp.ge.s32.totalorder %s40_s0, 6   ;;  %s6689_s4 = sld [smem:[#allocation7_spill]] }
 0xf71   : > { %s6690_s8 = sld [smem:[#allocation17_spill]]  ;;  %s6691_s30 = sld [smem:[#allocation10_spill]] }
 0xf72   : > { %s6692_s9 = sld [smem:[#allocation11_spill]]  ;;  %s6693_s5 = sld [smem:[#allocation13_spill]] }
 0xf73   : > { %s6694_s28 = sld [smem:[#allocation15_spill]]  ;;  %39 = sbr.rel (!%p37_p8) target bundleno = 32 (0x20), region = 245 }
 0xf7a   :  { %4373 = vsyncpa [#allocation3], 1 }
 0xf7b   :  { %4375 = vsyncpa [#allocation3 + $0x1], 1 }

</bundles_post_ra>
